<compile_context>
chip_gen: v7x
topology: tpu7x:2x2x1
jax: 0.10.0
libtpu: 0.0.40
codegen_flags: <defaults>
</compile_context>

<pallas_src>
import functools
import math

import jax
import jax.numpy as jnp
import numpy as np
from jax import lax
from jax.experimental import pallas as pl
from jax.experimental.pallas import tpu as pltpu

_MIB = 1024 * 1024
# Flips to False if single-buffered weight specs (pipeline_mode=pl.Buffered(1))
# are unsupported by the installed jax / Mosaic lowering.
_SINGLE_BUFFER_OK = [True]


def _round_up(x, m):
    return ((x + m - 1) // m) * m


def _const_spec(shape, single_buffer):
    """BlockSpec for a grid-invariant operand (weights / biases / LN params).

    With single_buffer=True the pipeliner keeps ONE resident copy instead of
    the default double buffer; these operands never change across the grid,
    so double-buffering them only wastes VMEM (decisive at real SETR sizes on
    v7x's 64 MiB VMEM)."""
    nd = len(shape)
    index_map = lambda *_: (0,) * nd
    if single_buffer:
        try:
            return pl.BlockSpec(shape, index_map, pipeline_mode=pl.Buffered(1))
        except Exception:
            _SINGLE_BUFFER_OK[0] = False
    return pl.BlockSpec(shape, index_map)


def _run_with_fallback(build_and_run):
    """Try the single-buffered-weights variant; fall back to default
    double-buffering if construction or lowering rejects it."""
    if _SINGLE_BUFFER_OK[0]:
        try:
            return build_and_run(True)
        except Exception:
            _SINGLE_BUFFER_OK[0] = False
    return build_and_run(False)


def _vmem_limit_bytes(est_bytes):
    try:
        cap = int(pltpu.get_tpu_info().vmem_capacity_bytes)
    except Exception:
        cap = 64 * _MIB                       # conservative (v7x physical VMEM)
    hi = min(cap - 8 * _MIB, 112 * _MIB)      # ~56 MiB on v7x, ~112 MiB on v5e/v6e
    return int(min(max(int(est_bytes), 32 * _MIB), hi))


def _default_q_tile():
    try:
        kind = jax.devices()[0].device_kind.lower()
    except Exception:
        kind = ""
    # v5e MXU is 4x128x128 -> tq=128; v6e/v7x have 256x256 MXUs -> tq=256.
    return 128 if "v5" in kind else 256


# ------------------------------ Pallas kernels ----------------------------- #
def qkv_proj_kernel(x_ref, wqkv_ref, bqkv_ref, q_ref, k_ref, v_ref,
                    *, num_heads, head_dim, hidden):
    """Fused Q/K/V projection for one (batch, sequence-tile) block.

    One MXU pass with N=3H, then a ONE-TIME head split into head-major
    (num_heads, tile, head_dim) bf16 outputs (Q pre-scaled by 1/sqrt(hd)).
    The split cost is amortized over every query tile of the layer kernel,
    which then never slices the 128-lane axis."""
    f32 = jnp.float32
    bf16 = jnp.bfloat16
    xb = x_ref[0]                                                   # (ts, H) bf16
    qkv = jnp.dot(xb, wqkv_ref[...], preferred_element_type=f32) + bqkv_ref[...]
    scale = 1.0 / math.sqrt(head_dim)
    for h in range(num_heads):                                      # static unroll
        lo = h * head_dim
        hi = lo + head_dim
        q_ref[0, h] = (qkv[:, lo:hi] * scale).astype(bf16)
        k_ref[0, h] = qkv[:, hidden + lo:hidden + hi].astype(bf16)
        v_ref[0, h] = qkv[:, 2 * hidden + lo:2 * hidden + hi].astype(bf16)


def trans_layer_kernel(
    xres_ref, q_ref, k_ref, v_ref,
    wao_ref, bao_ref, g1_ref, b1_ref,
    wi_ref, bi_ref, wo_ref, bo_ref, g2_ref, b2_ref,
    o_ref,
    *, num_heads, seq_len, eps,
):
    """Attention (head-major, batched over heads) + add&LN + GELU-FFN + add&LN
    for one (batch, query-tile) block.  Matmuls use bf16 operands with f32
    accumulation; softmax / LN math stays f32 (EUP reciprocal / rsqrt)."""
    f32 = jnp.float32
    bf16 = jnp.bfloat16

    q = q_ref[0]                              # (nh, tq, hd) bf16, pre-scaled
    k = k_ref[0]                              # (nh, S_pad, hd) bf16
    v = v_ref[0]                              # (nh, S_pad, hd) bf16

    # scores: one batched NT matmul over the head axis -> (nh, tq, S_pad)
    s = lax.dot_general(q, k, (((2,), (2,)), ((0,), (0,))),
                        preferred_element_type=f32)
    if s.shape[-1] != seq_len:                # static: mask zero-padded keys
        col = lax.broadcasted_iota(jnp.int32, s.shape, 2)
        s = jnp.where(col < seq_len, s, -1e30)
    s = s - jnp.max(s, axis=-1, keepdims=True)
    e = jnp.exp(s)
    p = e * pl.reciprocal(jnp.sum(e, axis=-1, keepdims=True), approx=True)

    # context stays head-major: (nh, tq, hd); no lane-axis reassembly pass.
    ctx = lax.dot_general(p.astype(bf16), v, (((2,), (1,)), ((0,), (0,))),
                          preferred_element_type=f32).astype(bf16)

    # attention-output dense: contract (head, head_dim) against head-major wao.
    wao = wao_ref[...]                        # (nh, hd, H) bf16
    attn = jnp.dot(ctx[0], wao[0], preferred_element_type=f32)
    for h in range(1, num_heads):
        attn = attn + jnp.dot(ctx[h], wao[h], preferred_element_type=f32)
    attn = attn + bao_ref[...]

    def layernorm(y, g, b):                   # f32 math; rsqrt -> EUP slot
        u = jnp.mean(y, axis=-1, keepdims=True)
        d = y - u
        var = jnp.mean(d * d, axis=-1, keepdims=True)
        return g * (d * lax.rsqrt(var + eps)) + b

    x_t = xres_ref[0]                         # (tq, H) f32 residual
    attn_ln = layernorm(attn + x_t, g1_ref[...], b1_ref[...])

    inter = jnp.dot(attn_ln.astype(bf16), wi_ref[...],
                    preferred_element_type=f32) + bi_ref[...]
    inter = inter * 0.5 * (1.0 + lax.erf(inter * (1.0 / math.sqrt(2.0))))

    ffn = jnp.dot(inter.astype(bf16), wo_ref[...],
                  preferred_element_type=f32) + bo_ref[...]
    o_ref[0] = layernorm(ffn + attn_ln, g2_ref[...], b2_ref[...])


# ------------------------------- JAX wrappers ------------------------------ #
def make_layer_params(key, hidden, intermediate, init_range=0.02):
    ks = jax.random.split(key, 6)
    f32 = jnp.float32
    return {
        "wq": jax.random.normal(ks[0], (hidden, hidden), f32) * init_range,
        "bq": jnp.zeros((1, hidden), f32),
        "wk": jax.random.normal(ks[1], (hidden, hidden), f32) * init_range,
        "bk": jnp.zeros((1, hidden), f32),
        "wv": jax.random.normal(ks[2], (hidden, hidden), f32) * init_range,
        "bv": jnp.zeros((1, hidden), f32),
        "wao": jax.random.normal(ks[3], (hidden, hidden), f32) * init_range,
        "bao": jnp.zeros((1, hidden), f32),
        "g1": jnp.ones((1, hidden), f32),
        "b1": jnp.zeros((1, hidden), f32),
        "wi": jax.random.normal(ks[4], (hidden, intermediate), f32) * init_range,
        "bi": jnp.zeros((1, intermediate), f32),
        "wo": jax.random.normal(ks[5], (intermediate, hidden), f32) * init_range,
        "bo": jnp.zeros((1, hidden), f32),
        "g2": jnp.ones((1, hidden), f32),
        "b2": jnp.zeros((1, hidden), f32),
    }


def trans_layer_pallas(x, params, num_heads, eps=1e-12, q_tile=None):
    """One TransLayer forward: fused-QKV-projection pallas_call followed by a
    fused attention/FFN pallas_call.  Returns (B, S, H) f32."""
    B, S, H = x.shape
    head_dim = H // num_heads
    I = params["wi"].shape[1]
    f32, bf16 = jnp.float32, jnp.bfloat16

    if q_tile is None:
        q_tile = _default_q_tile()
    tq = min(q_tile, _round_up(S, 8))
    S_pad = _round_up(S, tq)
    n_q = S_pad // tq

    x_f32 = x.astype(f32)
    if S_pad != S:
        x_f32 = jnp.pad(x_f32, ((0, 0), (0, S_pad - S), (0, 0)))
    x_bf16 = x_f32.astype(bf16)        # matmul-path copy: halves x HBM DMA

    # Fused QKV weight (H, 3H) bf16; head-major attention-output weight.
    wqkv = jnp.concatenate([params["wq"], params["wk"], params["wv"]],
                           axis=1).astype(bf16)
    bqkv = jnp.concatenate([params["bq"], params["bk"], params["bv"]],
                           axis=1).astype(f32)
    wao_hm = params["wao"].reshape(num_heads, head_dim, H).astype(bf16)
    wi = params["wi"].astype(bf16)
    wo = params["wo"].astype(bf16)
    bao = params["bao"].astype(f32)
    g1 = params["g1"].astype(f32)
    b1 = params["b1"].astype(f32)
    bi = params["bi"].astype(f32)
    bo = params["bo"].astype(f32)
    g2 = params["g2"].astype(f32)
    b2 = params["b2"].astype(f32)

    # ---------------- call 1: fused QKV projection (head-major out) ---------
    proj_kernel = functools.partial(qkv_proj_kernel, num_heads=num_heads,
                                    head_dim=head_dim, hidden=H)
    hm_shape = (B, num_heads, S_pad, head_dim)
    hm_block = (1, num_heads, tq, head_dim)

    def run_proj(single_buf):
        w_bytes = H * 3 * H * 2 + 3 * H * 4
        est = (w_bytes * (1 if single_buf else 2)
               + 2 * tq * H * 2 + 3 * 2 * tq * H * 2
               + 2 * tq * 3 * H * 4 + 2 * _MIB)
        cost = pl.CostEstimate(
            flops=int(2 * B * S_pad * H * 3 * H),
            transcendentals=0,
            bytes_accessed=int(4 * B * S_pad * H * 2 + w_bytes))
        return pl.pallas_call(
            proj_kernel,
            out_shape=(jax.ShapeDtypeStruct(hm_shape, bf16),
                       jax.ShapeDtypeStruct(hm_shape, bf16),
                       jax.ShapeDtypeStruct(hm_shape, bf16)),
            grid=(B, n_q),
            in_specs=[
                pl.BlockSpec((1, tq, H), lambda b, si: (b, si, 0)),
                _const_spec((H, 3 * H), single_buf),
                _const_spec((1, 3 * H), single_buf),
            ],
            out_specs=(
                pl.BlockSpec(hm_block, lambda b, si: (b, 0, si, 0)),
                pl.BlockSpec(hm_block, lambda b, si: (b, 0, si, 0)),
                pl.BlockSpec(hm_block, lambda b, si: (b, 0, si, 0)),
            ),
            compiler_params=pltpu.CompilerParams(
                dimension_semantics=("parallel", "parallel"),
                vmem_limit_bytes=_vmem_limit_bytes(est)),
            cost_estimate=cost,
        )(x_bf16, wqkv, bqkv)

    q_hm, k_hm, v_hm = _run_with_fallback(run_proj)

    # ---------------- call 2: attention + FFN layer -------------------------
    layer_kernel = functools.partial(trans_layer_kernel, num_heads=num_heads,
                                     seq_len=S, eps=eps)

    def run_layer(single_buf):
        w_bytes = (H * H * 2 + H * I * 2 + I * H * 2 + (6 * H + I) * 4)
        kv_bytes = 2 * 2 * S_pad * H * 2                  # K,V double-buffered bf16
        act_bytes = 2 * tq * H * (4 + 2 + 4)              # x_res, Q, out buffers
        tmp_bytes = (3 * num_heads * tq * S_pad * 4       # scores / probs temps
                     + 6 * tq * max(H, I) * 4)            # dense/LN temps
        est = (w_bytes * (1 if single_buf else 2) + kv_bytes + act_bytes
               + tmp_bytes + 2 * _MIB)
        cost = pl.CostEstimate(
            flops=int(4 * B * S_pad * S_pad * H + 2 * B * S_pad * H * H
                      + 4 * B * S_pad * H * I),
            transcendentals=int(B * num_heads * S_pad * S_pad + B * S_pad * I),
            bytes_accessed=int(B * S_pad * H * (4 + 3 * 2 + 4) + w_bytes))
        return pl.pallas_call(
            layer_kernel,
            out_shape=jax.ShapeDtypeStruct((B, S_pad, H), f32),
            grid=(B, n_q),
            in_specs=[
                pl.BlockSpec((1, tq, H), lambda b, qi: (b, qi, 0)),   # residual f32
                pl.BlockSpec((1, num_heads, tq, head_dim),
                             lambda b, qi: (b, 0, qi, 0)),            # Q tile
                pl.BlockSpec((1, num_heads, S_pad, head_dim),
                             lambda b, qi: (b, 0, 0, 0)),             # full K
                pl.BlockSpec((1, num_heads, S_pad, head_dim),
                             lambda b, qi: (b, 0, 0, 0)),             # full V
                _const_spec((num_heads, head_dim, H), single_buf),    # wao (head-major)
                _const_spec((1, H), single_buf),                      # bao
                _const_spec((1, H), single_buf),                      # g1
                _const_spec((1, H), single_buf),                      # b1
                _const_spec((H, I), single_buf),                      # wi
                _const_spec((1, I), single_buf),                      # bi
                _const_spec((I, H), single_buf),                      # wo
                _const_spec((1, H), single_buf),                      # bo
                _const_spec((1, H), single_buf),                      # g2
                _const_spec((1, H), single_buf),                      # b2
            ],
            out_specs=pl.BlockSpec((1, tq, H), lambda b, qi: (b, qi, 0)),
            compiler_params=pltpu.CompilerParams(
                dimension_semantics=("parallel", "parallel"),
                vmem_limit_bytes=_vmem_limit_bytes(est)),
            cost_estimate=cost,
        )(x_f32, q_hm, k_hm, v_hm, wao_hm, bao, g1, b1, wi, bi, wo, bo, g2, b2)

    out = _run_with_fallback(run_layer)
    if S_pad != S:
        out = out[:, :S, :]
    return out


def trans_encoder_pallas(hidden_states, layer_params, num_heads,
                         output_all_encoded_layers=True):
    """Mirrors TransEncoder.forward: returns list of per-layer outputs."""
    all_layers = []
    x = hidden_states
    for params in layer_params:
        x = trans_layer_pallas(x, params, num_heads)
        if output_all_encoded_layers:
            all_layers.append(x)
    if not output_all_encoded_layers:
        all_layers.append(x)
    return all_layers


# ---------------------------- pure-JAX reference --------------------------- #
def _layer_ref(x, p, num_heads, eps=1e-12):
    B, S, H = x.shape
    hd = H // num_heads

    def ln(y, g, b):
        u = jnp.mean(y, axis=-1, keepdims=True)
        s = jnp.mean((y - u) ** 2, axis=-1, keepdims=True)
        return g * ((y - u) / jnp.sqrt(s + eps)) + b

    q = x @ p["wq"] + p["bq"]
    k = x @ p["wk"] + p["bk"]
    v = x @ p["wv"] + p["bv"]
    q = q.reshape(B, S, num_heads, hd).transpose(0, 2, 1, 3)
    k = k.reshape(B, S, num_heads, hd).transpose(0, 2, 1, 3)
    v = v.reshape(B, S, num_heads, hd).transpose(0, 2, 1, 3)
    scores = jnp.einsum("bhqd,bhkd->bhqk", q, k) / math.sqrt(hd)
    probs = jax.nn.softmax(scores, axis=-1)
    ctx = jnp.einsum("bhqk,bhkd->bhqd", probs, v).transpose(0, 2, 1, 3).reshape(B, S, H)
    attn_ln = ln(ctx @ p["wao"] + p["bao"] + x, p["g1"], p["b1"])
    inter = attn_ln @ p["wi"] + p["bi"]
    inter = inter * 0.5 * (1.0 + jax.lax.erf(inter / math.sqrt(2.0)))
    return ln(inter @ p["wo"] + p["bo"] + attn_ln, p["g2"], p["b2"])


# ----------------------------------- main ----------------------------------- #
if __name__ == "__main__":
    # small config consistent with the module's forward
    B, S, H, I = 2, 8, 32, 64
    NUM_HEADS = 4
    NUM_LAYERS = 2

    key = jax.random.PRNGKey(0)
    key, xkey = jax.random.split(key)
    hidden_states = jax.random.normal(xkey, (B, S, H), jnp.float32)

    layer_keys = jax.random.split(key, NUM_LAYERS)
    layer_params = [make_layer_params(k, H, I) for k in layer_keys]

    outs = trans_encoder_pallas(hidden_states, layer_params, NUM_HEADS,
                                output_all_encoded_layers=True)
    outs = [jax.block_until_ready(o) for o in outs]

    # verify against pure-f32 JAX reference; tolerances loosened because the
    # kernel uses bf16 MXU operands (f32 accumulation, f32 LN/softmax math).
    x_ref = hidden_states
    for i, p in enumerate(layer_params):
        x_ref = _layer_ref(x_ref, p, NUM_HEADS)
        np.testing.assert_allclose(np.asarray(outs[i]), np.asarray(x_ref),
                                   rtol=5e-2, atol=5e-2)

    print("KERNEL_OK")
</pallas_src>

<mosaic_0001>
module attributes {stable_mosaic.version = 11 : i64} {
  func.func @qkv_proj_kernel(%arg0: i32, %arg1: i32, %arg2: memref<1x8x32xbf16, #tpu.memory_space<vmem>>, %arg3: memref<32x96xbf16, #tpu.memory_space<vmem>>, %arg4: memref<1x96xf32, #tpu.memory_space<vmem>>, %arg5: memref<1x4x8x8xbf16, #tpu.memory_space<vmem>>, %arg6: memref<1x4x8x8xbf16, #tpu.memory_space<vmem>>, %arg7: memref<1x4x8x8xbf16, #tpu.memory_space<vmem>>) attributes {dimension_semantics = [#tpu.dimension_semantics<parallel>, #tpu.dimension_semantics<parallel>], iteration_bounds = array<i64: 2, 1>, scalar_prefetch = 0 : i64, scratch_operands = 0 : i64, tpu.core_type = #tpu.core_type<tc>, window_params = [{transform_indices = @transform_0, window_bounds = array<i64: 1, 8, 32>}, {pipeline_mode = #tpu.pipeline_mode<synchronous>, transform_indices = @transform_1, window_bounds = array<i64: 32, 96>}, {pipeline_mode = #tpu.pipeline_mode<synchronous>, transform_indices = @transform_2, window_bounds = array<i64: 1, 96>}, {transform_indices = @transform_3, window_bounds = array<i64: 1, 4, 8, 8>}, {transform_indices = @transform_4, window_bounds = array<i64: 1, 4, 8, 8>}, {transform_indices = @transform_5, window_bounds = array<i64: 1, 4, 8, 8>}]} {
    %c0 = arith.constant 0 : index
    %c0_0 = arith.constant 0 : index
    %c0_1 = arith.constant 0 : index
    %0 = vector.load %arg2[%c0, %c0_0, %c0_1] : memref<1x8x32xbf16, #tpu.memory_space<vmem>>, vector<1x8x32xbf16>
    %1 = vector.shape_cast %0 : vector<1x8x32xbf16> to vector<8x32xbf16>
    %c0_2 = arith.constant 0 : index
    %c0_3 = arith.constant 0 : index
    %2 = vector.load %arg3[%c0_2, %c0_3] : memref<32x96xbf16, #tpu.memory_space<vmem>>, vector<32x96xbf16>
    %cst = arith.constant dense<0.000000e+00> : vector<8x96xf32>
    %3 = tpu.matmul %1, %2, %cst {dimension_numbers = #tpu.dot_dimension_numbers<[1], [0], [0], [1], [0, 0, 1, 1], [], []>} : vector<8x32xbf16>, vector<32x96xbf16>, vector<8x96xf32> -> vector<8x96xf32>
    %c0_4 = arith.constant 0 : index
    %c0_5 = arith.constant 0 : index
    %4 = vector.load %arg4[%c0_4, %c0_5] : memref<1x96xf32, #tpu.memory_space<vmem>>, vector<1x96xf32>
    %5 = vector.broadcast %4 : vector<1x96xf32> to vector<8x96xf32>
    %6 = arith.addf %3, %5 : vector<8x96xf32>
    %7 = vector.extract_strided_slice %6 {offsets = [0, 0], sizes = [8, 8], strides = [1, 1]} : vector<8x96xf32> to vector<8x8xf32>
    %cst_6 = arith.constant 0.353553385 : f32
    %8 = vector.broadcast %cst_6 : f32 to vector<8x8xf32>
    %9 = arith.mulf %7, %8 : vector<8x8xf32>
    %10 = arith.truncf %9 : vector<8x8xf32> to vector<8x8xbf16>
    %c0_7 = arith.constant 0 : index
    %c0_8 = arith.constant 0 : index
    %c0_9 = arith.constant 0 : index
    %c0_10 = arith.constant 0 : index
    %11 = vector.load %arg5[%c0_7, %c0_8, %c0_9, %c0_10] : memref<1x4x8x8xbf16, #tpu.memory_space<vmem>>, vector<1x1x8x8xbf16>
    %12 = vector.shape_cast %11 : vector<1x1x8x8xbf16> to vector<8x8xbf16>
    %13 = vector.shape_cast %10 : vector<8x8xbf16> to vector<1x1x8x8xbf16>
    tpu.vector_store %arg5[%c0_7, %c0_8, %c0_9, %c0_10], %13 {strides = array<i32>} : memref<1x4x8x8xbf16, #tpu.memory_space<vmem>>, vector<1x1x8x8xbf16>,
    %14 = vector.extract_strided_slice %6 {offsets = [0, 32], sizes = [8, 8], strides = [1, 1]} : vector<8x96xf32> to vector<8x8xf32>
    %15 = arith.truncf %14 : vector<8x8xf32> to vector<8x8xbf16>
    %c0_11 = arith.constant 0 : index
    %c0_12 = arith.constant 0 : index
    %c0_13 = arith.constant 0 : index
    %c0_14 = arith.constant 0 : index
    %16 = vector.load %arg6[%c0_11, %c0_12, %c0_13, %c0_14] : memref<1x4x8x8xbf16, #tpu.memory_space<vmem>>, vector<1x1x8x8xbf16>
    %17 = vector.shape_cast %16 : vector<1x1x8x8xbf16> to vector<8x8xbf16>
    %18 = vector.shape_cast %15 : vector<8x8xbf16> to vector<1x1x8x8xbf16>
    tpu.vector_store %arg6[%c0_11, %c0_12, %c0_13, %c0_14], %18 {strides = array<i32>} : memref<1x4x8x8xbf16, #tpu.memory_space<vmem>>, vector<1x1x8x8xbf16>,
    %19 = vector.extract_strided_slice %6 {offsets = [0, 64], sizes = [8, 8], strides = [1, 1]} : vector<8x96xf32> to vector<8x8xf32>
    %20 = arith.truncf %19 : vector<8x8xf32> to vector<8x8xbf16>
    %c0_15 = arith.constant 0 : index
    %c0_16 = arith.constant 0 : index
    %c0_17 = arith.constant 0 : index
    %c0_18 = arith.constant 0 : index
    %21 = vector.load %arg7[%c0_15, %c0_16, %c0_17, %c0_18] : memref<1x4x8x8xbf16, #tpu.memory_space<vmem>>, vector<1x1x8x8xbf16>
    %22 = vector.shape_cast %21 : vector<1x1x8x8xbf16> to vector<8x8xbf16>
    %23 = vector.shape_cast %20 : vector<8x8xbf16> to vector<1x1x8x8xbf16>
    tpu.vector_store %arg7[%c0_15, %c0_16, %c0_17, %c0_18], %23 {strides = array<i32>} : memref<1x4x8x8xbf16, #tpu.memory_space<vmem>>, vector<1x1x8x8xbf16>,
    %24 = vector.extract_strided_slice %6 {offsets = [0, 8], sizes = [8, 8], strides = [1, 1]} : vector<8x96xf32> to vector<8x8xf32>
    %cst_19 = arith.constant 0.353553385 : f32
    %25 = vector.broadcast %cst_19 : f32 to vector<8x8xf32>
    %26 = arith.mulf %24, %25 : vector<8x8xf32>
    %27 = arith.truncf %26 : vector<8x8xf32> to vector<8x8xbf16>
    %c0_20 = arith.constant 0 : index
    %c1 = arith.constant 1 : index
    %c0_21 = arith.constant 0 : index
    %c0_22 = arith.constant 0 : index
    %28 = vector.load %arg5[%c0_20, %c1, %c0_21, %c0_22] : memref<1x4x8x8xbf16, #tpu.memory_space<vmem>>, vector<1x1x8x8xbf16>
    %29 = vector.shape_cast %28 : vector<1x1x8x8xbf16> to vector<8x8xbf16>
    %30 = vector.shape_cast %27 : vector<8x8xbf16> to vector<1x1x8x8xbf16>
    tpu.vector_store %arg5[%c0_20, %c1, %c0_21, %c0_22], %30 {strides = array<i32>} : memref<1x4x8x8xbf16, #tpu.memory_space<vmem>>, vector<1x1x8x8xbf16>,
    %31 = vector.extract_strided_slice %6 {offsets = [0, 40], sizes = [8, 8], strides = [1, 1]} : vector<8x96xf32> to vector<8x8xf32>
    %32 = arith.truncf %31 : vector<8x8xf32> to vector<8x8xbf16>
    %c0_23 = arith.constant 0 : index
    %c1_24 = arith.constant 1 : index
    %c0_25 = arith.constant 0 : index
    %c0_26 = arith.constant 0 : index
    %33 = vector.load %arg6[%c0_23, %c1_24, %c0_25, %c0_26] : memref<1x4x8x8xbf16, #tpu.memory_space<vmem>>, vector<1x1x8x8xbf16>
    %34 = vector.shape_cast %33 : vector<1x1x8x8xbf16> to vector<8x8xbf16>
    %35 = vector.shape_cast %32 : vector<8x8xbf16> to vector<1x1x8x8xbf16>
    tpu.vector_store %arg6[%c0_23, %c1_24, %c0_25, %c0_26], %35 {strides = array<i32>} : memref<1x4x8x8xbf16, #tpu.memory_space<vmem>>, vector<1x1x8x8xbf16>,
    %36 = vector.extract_strided_slice %6 {offsets = [0, 72], sizes = [8, 8], strides = [1, 1]} : vector<8x96xf32> to vector<8x8xf32>
    %37 = arith.truncf %36 : vector<8x8xf32> to vector<8x8xbf16>
    %c0_27 = arith.constant 0 : index
    %c1_28 = arith.constant 1 : index
    %c0_29 = arith.constant 0 : index
    %c0_30 = arith.constant 0 : index
    %38 = vector.load %arg7[%c0_27, %c1_28, %c0_29, %c0_30] : memref<1x4x8x8xbf16, #tpu.memory_space<vmem>>, vector<1x1x8x8xbf16>
    %39 = vector.shape_cast %38 : vector<1x1x8x8xbf16> to vector<8x8xbf16>
    %40 = vector.shape_cast %37 : vector<8x8xbf16> to vector<1x1x8x8xbf16>
    tpu.vector_store %arg7[%c0_27, %c1_28, %c0_29, %c0_30], %40 {strides = array<i32>} : memref<1x4x8x8xbf16, #tpu.memory_space<vmem>>, vector<1x1x8x8xbf16>,
    %41 = vector.extract_strided_slice %6 {offsets = [0, 16], sizes = [8, 8], strides = [1, 1]} : vector<8x96xf32> to vector<8x8xf32>
    %cst_31 = arith.constant 0.353553385 : f32
    %42 = vector.broadcast %cst_31 : f32 to vector<8x8xf32>
    %43 = arith.mulf %41, %42 : vector<8x8xf32>
    %44 = arith.truncf %43 : vector<8x8xf32> to vector<8x8xbf16>
    %c0_32 = arith.constant 0 : index
    %c2 = arith.constant 2 : index
    %c0_33 = arith.constant 0 : index
    %c0_34 = arith.constant 0 : index
    %45 = vector.load %arg5[%c0_32, %c2, %c0_33, %c0_34] : memref<1x4x8x8xbf16, #tpu.memory_space<vmem>>, vector<1x1x8x8xbf16>
    %46 = vector.shape_cast %45 : vector<1x1x8x8xbf16> to vector<8x8xbf16>
    %47 = vector.shape_cast %44 : vector<8x8xbf16> to vector<1x1x8x8xbf16>
    tpu.vector_store %arg5[%c0_32, %c2, %c0_33, %c0_34], %47 {strides = array<i32>} : memref<1x4x8x8xbf16, #tpu.memory_space<vmem>>, vector<1x1x8x8xbf16>,
    %48 = vector.extract_strided_slice %6 {offsets = [0, 48], sizes = [8, 8], strides = [1, 1]} : vector<8x96xf32> to vector<8x8xf32>
    %49 = arith.truncf %48 : vector<8x8xf32> to vector<8x8xbf16>
    %c0_35 = arith.constant 0 : index
    %c2_36 = arith.constant 2 : index
    %c0_37 = arith.constant 0 : index
    %c0_38 = arith.constant 0 : index
    %50 = vector.load %arg6[%c0_35, %c2_36, %c0_37, %c0_38] : memref<1x4x8x8xbf16, #tpu.memory_space<vmem>>, vector<1x1x8x8xbf16>
    %51 = vector.shape_cast %50 : vector<1x1x8x8xbf16> to vector<8x8xbf16>
    %52 = vector.shape_cast %49 : vector<8x8xbf16> to vector<1x1x8x8xbf16>
    tpu.vector_store %arg6[%c0_35, %c2_36, %c0_37, %c0_38], %52 {strides = array<i32>} : memref<1x4x8x8xbf16, #tpu.memory_space<vmem>>, vector<1x1x8x8xbf16>,
    %53 = vector.extract_strided_slice %6 {offsets = [0, 80], sizes = [8, 8], strides = [1, 1]} : vector<8x96xf32> to vector<8x8xf32>
    %54 = arith.truncf %53 : vector<8x8xf32> to vector<8x8xbf16>
    %c0_39 = arith.constant 0 : index
    %c2_40 = arith.constant 2 : index
    %c0_41 = arith.constant 0 : index
    %c0_42 = arith.constant 0 : index
    %55 = vector.load %arg7[%c0_39, %c2_40, %c0_41, %c0_42] : memref<1x4x8x8xbf16, #tpu.memory_space<vmem>>, vector<1x1x8x8xbf16>
    %56 = vector.shape_cast %55 : vector<1x1x8x8xbf16> to vector<8x8xbf16>
    %57 = vector.shape_cast %54 : vector<8x8xbf16> to vector<1x1x8x8xbf16>
    tpu.vector_store %arg7[%c0_39, %c2_40, %c0_41, %c0_42], %57 {strides = array<i32>} : memref<1x4x8x8xbf16, #tpu.memory_space<vmem>>, vector<1x1x8x8xbf16>,
    %58 = vector.extract_strided_slice %6 {offsets = [0, 24], sizes = [8, 8], strides = [1, 1]} : vector<8x96xf32> to vector<8x8xf32>
    %cst_43 = arith.constant 0.353553385 : f32
    %59 = vector.broadcast %cst_43 : f32 to vector<8x8xf32>
    %60 = arith.mulf %58, %59 : vector<8x8xf32>
    %61 = arith.truncf %60 : vector<8x8xf32> to vector<8x8xbf16>
    %c0_44 = arith.constant 0 : index
    %c3 = arith.constant 3 : index
    %c0_45 = arith.constant 0 : index
    %c0_46 = arith.constant 0 : index
    %62 = vector.load %arg5[%c0_44, %c3, %c0_45, %c0_46] : memref<1x4x8x8xbf16, #tpu.memory_space<vmem>>, vector<1x1x8x8xbf16>
    %63 = vector.shape_cast %62 : vector<1x1x8x8xbf16> to vector<8x8xbf16>
    %64 = vector.shape_cast %61 : vector<8x8xbf16> to vector<1x1x8x8xbf16>
    tpu.vector_store %arg5[%c0_44, %c3, %c0_45, %c0_46], %64 {strides = array<i32>} : memref<1x4x8x8xbf16, #tpu.memory_space<vmem>>, vector<1x1x8x8xbf16>,
    %65 = vector.extract_strided_slice %6 {offsets = [0, 56], sizes = [8, 8], strides = [1, 1]} : vector<8x96xf32> to vector<8x8xf32>
    %66 = arith.truncf %65 : vector<8x8xf32> to vector<8x8xbf16>
    %c0_47 = arith.constant 0 : index
    %c3_48 = arith.constant 3 : index
    %c0_49 = arith.constant 0 : index
    %c0_50 = arith.constant 0 : index
    %67 = vector.load %arg6[%c0_47, %c3_48, %c0_49, %c0_50] : memref<1x4x8x8xbf16, #tpu.memory_space<vmem>>, vector<1x1x8x8xbf16>
    %68 = vector.shape_cast %67 : vector<1x1x8x8xbf16> to vector<8x8xbf16>
    %69 = vector.shape_cast %66 : vector<8x8xbf16> to vector<1x1x8x8xbf16>
    tpu.vector_store %arg6[%c0_47, %c3_48, %c0_49, %c0_50], %69 {strides = array<i32>} : memref<1x4x8x8xbf16, #tpu.memory_space<vmem>>, vector<1x1x8x8xbf16>,
    %70 = vector.extract_strided_slice %6 {offsets = [0, 88], sizes = [8, 8], strides = [1, 1]} : vector<8x96xf32> to vector<8x8xf32>
    %71 = arith.truncf %70 : vector<8x8xf32> to vector<8x8xbf16>
    %c0_51 = arith.constant 0 : index
    %c3_52 = arith.constant 3 : index
    %c0_53 = arith.constant 0 : index
    %c0_54 = arith.constant 0 : index
    %72 = vector.load %arg7[%c0_51, %c3_52, %c0_53, %c0_54] : memref<1x4x8x8xbf16, #tpu.memory_space<vmem>>, vector<1x1x8x8xbf16>
    %73 = vector.shape_cast %72 : vector<1x1x8x8xbf16> to vector<8x8xbf16>
    %74 = vector.shape_cast %71 : vector<8x8xbf16> to vector<1x1x8x8xbf16>
    tpu.vector_store %arg7[%c0_51, %c3_52, %c0_53, %c0_54], %74 {strides = array<i32>} : memref<1x4x8x8xbf16, #tpu.memory_space<vmem>>, vector<1x1x8x8xbf16>,
    return
  }
  func.func @transform_0(%arg0: i32, %arg1: i32) -> (i32, i32, i32) {
    %c0_i32 = arith.constant 0 : i32
    %c0_i32_0 = arith.constant 0 : i32
    return %arg0, %arg1, %c0_i32 : i32, i32, i32
  }
  func.func @transform_1(%arg0: i32, %arg1: i32) -> (i32, i32) {
    %c0_i32 = arith.constant 0 : i32
    %c0_i32_0 = arith.constant 0 : i32
    %c0_i32_1 = arith.constant 0 : i32
    return %c0_i32, %c0_i32_0 : i32, i32
  }
  func.func @transform_2(%arg0: i32, %arg1: i32) -> (i32, i32) {
    %c0_i32 = arith.constant 0 : i32
    %c0_i32_0 = arith.constant 0 : i32
    %c0_i32_1 = arith.constant 0 : i32
    return %c0_i32, %c0_i32_0 : i32, i32
  }
  func.func @transform_3(%arg0: i32, %arg1: i32) -> (i32, i32, i32, i32) {
    %c0_i32 = arith.constant 0 : i32
    %c0_i32_0 = arith.constant 0 : i32
    %c0_i32_1 = arith.constant 0 : i32
    return %arg0, %c0_i32, %arg1, %c0_i32_0 : i32, i32, i32, i32
  }
  func.func @transform_4(%arg0: i32, %arg1: i32) -> (i32, i32, i32, i32) {
    %c0_i32 = arith.constant 0 : i32
    %c0_i32_0 = arith.constant 0 : i32
    %c0_i32_1 = arith.constant 0 : i32
    return %arg0, %c0_i32, %arg1, %c0_i32_0 : i32, i32, i32, i32
  }
  func.func @transform_5(%arg0: i32, %arg1: i32) -> (i32, i32, i32, i32) {
    %c0_i32 = arith.constant 0 : i32
    %c0_i32_0 = arith.constant 0 : i32
    %c0_i32_1 = arith.constant 0 : i32
    return %arg0, %c0_i32, %arg1, %c0_i32_0 : i32, i32, i32, i32
  }
}

module attributes {stable_mosaic.version = 11 : i64} {
  func.func @qkv_proj_kernel(%arg0: i32, %arg1: i32, %arg2: memref<1x8x32xbf16, #tpu.memory_space<vmem>>, %arg3: memref<32x96xbf16, #tpu.memory_space<vmem>>, %arg4: memref<1x96xf32, #tpu.memory_space<vmem>>, %arg5: memref<1x4x8x8xbf16, #tpu.memory_space<vmem>>, %arg6: memref<1x4x8x8xbf16, #tpu.memory_space<vmem>>, %arg7: memref<1x4x8x8xbf16, #tpu.memory_space<vmem>>) attributes {dimension_semantics = [#tpu.dimension_semantics<parallel>, #tpu.dimension_semantics<parallel>], iteration_bounds = array<i64: 2, 1>, scalar_prefetch = 0 : i64, scratch_operands = 0 : i64, tpu.core_type = #tpu.core_type<tc>, window_params = [{transform_indices = @transform_0, window_bounds = array<i64: 1, 8, 32>}, {pipeline_mode = #tpu.pipeline_mode<synchronous>, transform_indices = @transform_1, window_bounds = array<i64: 32, 96>}, {pipeline_mode = #tpu.pipeline_mode<synchronous>, transform_indices = @transform_2, window_bounds = array<i64: 1, 96>}, {transform_indices = @transform_3, window_bounds = array<i64: 1, 4, 8, 8>}, {transform_indices = @transform_4, window_bounds = array<i64: 1, 4, 8, 8>}, {transform_indices = @transform_5, window_bounds = array<i64: 1, 4, 8, 8>}]} {
    %c0 = arith.constant 0 : index
    %c0_0 = arith.constant 0 : index
    %c0_1 = arith.constant 0 : index
    %0 = vector.load %arg2[%c0, %c0_0, %c0_1] : memref<1x8x32xbf16, #tpu.memory_space<vmem>>, vector<1x8x32xbf16>
    %1 = vector.shape_cast %0 : vector<1x8x32xbf16> to vector<8x32xbf16>
    %c0_2 = arith.constant 0 : index
    %c0_3 = arith.constant 0 : index
    %2 = vector.load %arg3[%c0_2, %c0_3] : memref<32x96xbf16, #tpu.memory_space<vmem>>, vector<32x96xbf16>
    %cst = arith.constant dense<0.000000e+00> : vector<8x96xf32>
    %3 = tpu.matmul %1, %2, %cst {dimension_numbers = #tpu.dot_dimension_numbers<[1], [0], [0], [1], [0, 0, 1, 1], [], []>} : vector<8x32xbf16>, vector<32x96xbf16>, vector<8x96xf32> -> vector<8x96xf32>
    %c0_4 = arith.constant 0 : index
    %c0_5 = arith.constant 0 : index
    %4 = vector.load %arg4[%c0_4, %c0_5] : memref<1x96xf32, #tpu.memory_space<vmem>>, vector<1x96xf32>
    %5 = vector.broadcast %4 : vector<1x96xf32> to vector<8x96xf32>
    %6 = arith.addf %3, %5 : vector<8x96xf32>
    %7 = vector.extract_strided_slice %6 {offsets = [0, 0], sizes = [8, 8], strides = [1, 1]} : vector<8x96xf32> to vector<8x8xf32>
    %cst_6 = arith.constant 0.353553385 : f32
    %8 = vector.broadcast %cst_6 : f32 to vector<8x8xf32>
    %9 = arith.mulf %7, %8 : vector<8x8xf32>
    %10 = arith.truncf %9 : vector<8x8xf32> to vector<8x8xbf16>
    %c0_7 = arith.constant 0 : index
    %c0_8 = arith.constant 0 : index
    %c0_9 = arith.constant 0 : index
    %c0_10 = arith.constant 0 : index
    %11 = vector.load %arg5[%c0_7, %c0_8, %c0_9, %c0_10] : memref<1x4x8x8xbf16, #tpu.memory_space<vmem>>, vector<1x1x8x8xbf16>
    %12 = vector.shape_cast %11 : vector<1x1x8x8xbf16> to vector<8x8xbf16>
    %13 = vector.shape_cast %10 : vector<8x8xbf16> to vector<1x1x8x8xbf16>
    tpu.vector_store %arg5[%c0_7, %c0_8, %c0_9, %c0_10], %13 {strides = array<i32>} : memref<1x4x8x8xbf16, #tpu.memory_space<vmem>>, vector<1x1x8x8xbf16>,
    %14 = vector.extract_strided_slice %6 {offsets = [0, 32], sizes = [8, 8], strides = [1, 1]} : vector<8x96xf32> to vector<8x8xf32>
    %15 = arith.truncf %14 : vector<8x8xf32> to vector<8x8xbf16>
    %c0_11 = arith.constant 0 : index
    %c0_12 = arith.constant 0 : index
    %c0_13 = arith.constant 0 : index
    %c0_14 = arith.constant 0 : index
    %16 = vector.load %arg6[%c0_11, %c0_12, %c0_13, %c0_14] : memref<1x4x8x8xbf16, #tpu.memory_space<vmem>>, vector<1x1x8x8xbf16>
    %17 = vector.shape_cast %16 : vector<1x1x8x8xbf16> to vector<8x8xbf16>
    %18 = vector.shape_cast %15 : vector<8x8xbf16> to vector<1x1x8x8xbf16>
    tpu.vector_store %arg6[%c0_11, %c0_12, %c0_13, %c0_14], %18 {strides = array<i32>} : memref<1x4x8x8xbf16, #tpu.memory_space<vmem>>, vector<1x1x8x8xbf16>,
    %19 = vector.extract_strided_slice %6 {offsets = [0, 64], sizes = [8, 8], strides = [1, 1]} : vector<8x96xf32> to vector<8x8xf32>
    %20 = arith.truncf %19 : vector<8x8xf32> to vector<8x8xbf16>
    %c0_15 = arith.constant 0 : index
    %c0_16 = arith.constant 0 : index
    %c0_17 = arith.constant 0 : index
    %c0_18 = arith.constant 0 : index
    %21 = vector.load %arg7[%c0_15, %c0_16, %c0_17, %c0_18] : memref<1x4x8x8xbf16, #tpu.memory_space<vmem>>, vector<1x1x8x8xbf16>
    %22 = vector.shape_cast %21 : vector<1x1x8x8xbf16> to vector<8x8xbf16>
    %23 = vector.shape_cast %20 : vector<8x8xbf16> to vector<1x1x8x8xbf16>
    tpu.vector_store %arg7[%c0_15, %c0_16, %c0_17, %c0_18], %23 {strides = array<i32>} : memref<1x4x8x8xbf16, #tpu.memory_space<vmem>>, vector<1x1x8x8xbf16>,
    %24 = vector.extract_strided_slice %6 {offsets = [0, 8], sizes = [8, 8], strides = [1, 1]} : vector<8x96xf32> to vector<8x8xf32>
    %cst_19 = arith.constant 0.353553385 : f32
    %25 = vector.broadcast %cst_19 : f32 to vector<8x8xf32>
    %26 = arith.mulf %24, %25 : vector<8x8xf32>
    %27 = arith.truncf %26 : vector<8x8xf32> to vector<8x8xbf16>
    %c0_20 = arith.constant 0 : index
    %c1 = arith.constant 1 : index
    %c0_21 = arith.constant 0 : index
    %c0_22 = arith.constant 0 : index
    %28 = vector.load %arg5[%c0_20, %c1, %c0_21, %c0_22] : memref<1x4x8x8xbf16, #tpu.memory_space<vmem>>, vector<1x1x8x8xbf16>
    %29 = vector.shape_cast %28 : vector<1x1x8x8xbf16> to vector<8x8xbf16>
    %30 = vector.shape_cast %27 : vector<8x8xbf16> to vector<1x1x8x8xbf16>
    tpu.vector_store %arg5[%c0_20, %c1, %c0_21, %c0_22], %30 {strides = array<i32>} : memref<1x4x8x8xbf16, #tpu.memory_space<vmem>>, vector<1x1x8x8xbf16>,
    %31 = vector.extract_strided_slice %6 {offsets = [0, 40], sizes = [8, 8], strides = [1, 1]} : vector<8x96xf32> to vector<8x8xf32>
    %32 = arith.truncf %31 : vector<8x8xf32> to vector<8x8xbf16>
    %c0_23 = arith.constant 0 : index
    %c1_24 = arith.constant 1 : index
    %c0_25 = arith.constant 0 : index
    %c0_26 = arith.constant 0 : index
    %33 = vector.load %arg6[%c0_23, %c1_24, %c0_25, %c0_26] : memref<1x4x8x8xbf16, #tpu.memory_space<vmem>>, vector<1x1x8x8xbf16>
    %34 = vector.shape_cast %33 : vector<1x1x8x8xbf16> to vector<8x8xbf16>
    %35 = vector.shape_cast %32 : vector<8x8xbf16> to vector<1x1x8x8xbf16>
    tpu.vector_store %arg6[%c0_23, %c1_24, %c0_25, %c0_26], %35 {strides = array<i32>} : memref<1x4x8x8xbf16, #tpu.memory_space<vmem>>, vector<1x1x8x8xbf16>,
    %36 = vector.extract_strided_slice %6 {offsets = [0, 72], sizes = [8, 8], strides = [1, 1]} : vector<8x96xf32> to vector<8x8xf32>
    %37 = arith.truncf %36 : vector<8x8xf32> to vector<8x8xbf16>
    %c0_27 = arith.constant 0 : index
    %c1_28 = arith.constant 1 : index
    %c0_29 = arith.constant 0 : index
    %c0_30 = arith.constant 0 : index
    %38 = vector.load %arg7[%c0_27, %c1_28, %c0_29, %c0_30] : memref<1x4x8x8xbf16, #tpu.memory_space<vmem>>, vector<1x1x8x8xbf16>
    %39 = vector.shape_cast %38 : vector<1x1x8x8xbf16> to vector<8x8xbf16>
    %40 = vector.shape_cast %37 : vector<8x8xbf16> to vector<1x1x8x8xbf16>
    tpu.vector_store %arg7[%c0_27, %c1_28, %c0_29, %c0_30], %40 {strides = array<i32>} : memref<1x4x8x8xbf16, #tpu.memory_space<vmem>>, vector<1x1x8x8xbf16>,
    %41 = vector.extract_strided_slice %6 {offsets = [0, 16], sizes = [8, 8], strides = [1, 1]} : vector<8x96xf32> to vector<8x8xf32>
    %cst_31 = arith.constant 0.353553385 : f32
    %42 = vector.broadcast %cst_31 : f32 to vector<8x8xf32>
    %43 = arith.mulf %41, %42 : vector<8x8xf32>
    %44 = arith.truncf %43 : vector<8x8xf32> to vector<8x8xbf16>
    %c0_32 = arith.constant 0 : index
    %c2 = arith.constant 2 : index
    %c0_33 = arith.constant 0 : index
    %c0_34 = arith.constant 0 : index
    %45 = vector.load %arg5[%c0_32, %c2, %c0_33, %c0_34] : memref<1x4x8x8xbf16, #tpu.memory_space<vmem>>, vector<1x1x8x8xbf16>
    %46 = vector.shape_cast %45 : vector<1x1x8x8xbf16> to vector<8x8xbf16>
    %47 = vector.shape_cast %44 : vector<8x8xbf16> to vector<1x1x8x8xbf16>
    tpu.vector_store %arg5[%c0_32, %c2, %c0_33, %c0_34], %47 {strides = array<i32>} : memref<1x4x8x8xbf16, #tpu.memory_space<vmem>>, vector<1x1x8x8xbf16>,
    %48 = vector.extract_strided_slice %6 {offsets = [0, 48], sizes = [8, 8], strides = [1, 1]} : vector<8x96xf32> to vector<8x8xf32>
    %49 = arith.truncf %48 : vector<8x8xf32> to vector<8x8xbf16>
    %c0_35 = arith.constant 0 : index
    %c2_36 = arith.constant 2 : index
    %c0_37 = arith.constant 0 : index
    %c0_38 = arith.constant 0 : index
    %50 = vector.load %arg6[%c0_35, %c2_36, %c0_37, %c0_38] : memref<1x4x8x8xbf16, #tpu.memory_space<vmem>>, vector<1x1x8x8xbf16>
    %51 = vector.shape_cast %50 : vector<1x1x8x8xbf16> to vector<8x8xbf16>
    %52 = vector.shape_cast %49 : vector<8x8xbf16> to vector<1x1x8x8xbf16>
    tpu.vector_store %arg6[%c0_35, %c2_36, %c0_37, %c0_38], %52 {strides = array<i32>} : memref<1x4x8x8xbf16, #tpu.memory_space<vmem>>, vector<1x1x8x8xbf16>,
    %53 = vector.extract_strided_slice %6 {offsets = [0, 80], sizes = [8, 8], strides = [1, 1]} : vector<8x96xf32> to vector<8x8xf32>
    %54 = arith.truncf %53 : vector<8x8xf32> to vector<8x8xbf16>
    %c0_39 = arith.constant 0 : index
    %c2_40 = arith.constant 2 : index
    %c0_41 = arith.constant 0 : index
    %c0_42 = arith.constant 0 : index
    %55 = vector.load %arg7[%c0_39, %c2_40, %c0_41, %c0_42] : memref<1x4x8x8xbf16, #tpu.memory_space<vmem>>, vector<1x1x8x8xbf16>
    %56 = vector.shape_cast %55 : vector<1x1x8x8xbf16> to vector<8x8xbf16>
    %57 = vector.shape_cast %54 : vector<8x8xbf16> to vector<1x1x8x8xbf16>
    tpu.vector_store %arg7[%c0_39, %c2_40, %c0_41, %c0_42], %57 {strides = array<i32>} : memref<1x4x8x8xbf16, #tpu.memory_space<vmem>>, vector<1x1x8x8xbf16>,
    %58 = vector.extract_strided_slice %6 {offsets = [0, 24], sizes = [8, 8], strides = [1, 1]} : vector<8x96xf32> to vector<8x8xf32>
    %cst_43 = arith.constant 0.353553385 : f32
    %59 = vector.broadcast %cst_43 : f32 to vector<8x8xf32>
    %60 = arith.mulf %58, %59 : vector<8x8xf32>
    %61 = arith.truncf %60 : vector<8x8xf32> to vector<8x8xbf16>
    %c0_44 = arith.constant 0 : index
    %c3 = arith.constant 3 : index
    %c0_45 = arith.constant 0 : index
    %c0_46 = arith.constant 0 : index
    %62 = vector.load %arg5[%c0_44, %c3, %c0_45, %c0_46] : memref<1x4x8x8xbf16, #tpu.memory_space<vmem>>, vector<1x1x8x8xbf16>
    %63 = vector.shape_cast %62 : vector<1x1x8x8xbf16> to vector<8x8xbf16>
    %64 = vector.shape_cast %61 : vector<8x8xbf16> to vector<1x1x8x8xbf16>
    tpu.vector_store %arg5[%c0_44, %c3, %c0_45, %c0_46], %64 {strides = array<i32>} : memref<1x4x8x8xbf16, #tpu.memory_space<vmem>>, vector<1x1x8x8xbf16>,
    %65 = vector.extract_strided_slice %6 {offsets = [0, 56], sizes = [8, 8], strides = [1, 1]} : vector<8x96xf32> to vector<8x8xf32>
    %66 = arith.truncf %65 : vector<8x8xf32> to vector<8x8xbf16>
    %c0_47 = arith.constant 0 : index
    %c3_48 = arith.constant 3 : index
    %c0_49 = arith.constant 0 : index
    %c0_50 = arith.constant 0 : index
    %67 = vector.load %arg6[%c0_47, %c3_48, %c0_49, %c0_50] : memref<1x4x8x8xbf16, #tpu.memory_space<vmem>>, vector<1x1x8x8xbf16>
    %68 = vector.shape_cast %67 : vector<1x1x8x8xbf16> to vector<8x8xbf16>
    %69 = vector.shape_cast %66 : vector<8x8xbf16> to vector<1x1x8x8xbf16>
    tpu.vector_store %arg6[%c0_47, %c3_48, %c0_49, %c0_50], %69 {strides = array<i32>} : memref<1x4x8x8xbf16, #tpu.memory_space<vmem>>, vector<1x1x8x8xbf16>,
    %70 = vector.extract_strided_slice %6 {offsets = [0, 88], sizes = [8, 8], strides = [1, 1]} : vector<8x96xf32> to vector<8x8xf32>
    %71 = arith.truncf %70 : vector<8x8xf32> to vector<8x8xbf16>
    %c0_51 = arith.constant 0 : index
    %c3_52 = arith.constant 3 : index
    %c0_53 = arith.constant 0 : index
    %c0_54 = arith.constant 0 : index
    %72 = vector.load %arg7[%c0_51, %c3_52, %c0_53, %c0_54] : memref<1x4x8x8xbf16, #tpu.memory_space<vmem>>, vector<1x1x8x8xbf16>
    %73 = vector.shape_cast %72 : vector<1x1x8x8xbf16> to vector<8x8xbf16>
    %74 = vector.shape_cast %71 : vector<8x8xbf16> to vector<1x1x8x8xbf16>
    tpu.vector_store %arg7[%c0_51, %c3_52, %c0_53, %c0_54], %74 {strides = array<i32>} : memref<1x4x8x8xbf16, #tpu.memory_space<vmem>>, vector<1x1x8x8xbf16>,
    return
  }
  func.func @transform_0(%arg0: i32, %arg1: i32) -> (i32, i32, i32) {
    %c0_i32 = arith.constant 0 : i32
    %c0_i32_0 = arith.constant 0 : i32
    return %arg0, %arg1, %c0_i32 : i32, i32, i32
  }
  func.func @transform_1(%arg0: i32, %arg1: i32) -> (i32, i32) {
    %c0_i32 = arith.constant 0 : i32
    %c0_i32_0 = arith.constant 0 : i32
    %c0_i32_1 = arith.constant 0 : i32
    return %c0_i32, %c0_i32_0 : i32, i32
  }
  func.func @transform_2(%arg0: i32, %arg1: i32) -> (i32, i32) {
    %c0_i32 = arith.constant 0 : i32
    %c0_i32_0 = arith.constant 0 : i32
    %c0_i32_1 = arith.constant 0 : i32
    return %c0_i32, %c0_i32_0 : i32, i32
  }
  func.func @transform_3(%arg0: i32, %arg1: i32) -> (i32, i32, i32, i32) {
    %c0_i32 = arith.constant 0 : i32
    %c0_i32_0 = arith.constant 0 : i32
    %c0_i32_1 = arith.constant 0 : i32
    return %arg0, %c0_i32, %arg1, %c0_i32_0 : i32, i32, i32, i32
  }
  func.func @transform_4(%arg0: i32, %arg1: i32) -> (i32, i32, i32, i32) {
    %c0_i32 = arith.constant 0 : i32
    %c0_i32_0 = arith.constant 0 : i32
    %c0_i32_1 = arith.constant 0 : i32
    return %arg0, %c0_i32, %arg1, %c0_i32_0 : i32, i32, i32, i32
  }
  func.func @transform_5(%arg0: i32, %arg1: i32) -> (i32, i32, i32, i32) {
    %c0_i32 = arith.constant 0 : i32
    %c0_i32_0 = arith.constant 0 : i32
    %c0_i32_1 = arith.constant 0 : i32
    return %arg0, %c0_i32, %arg1, %c0_i32_0 : i32, i32, i32, i32
  }
}

</mosaic_0001>

<bundles_post_ra>
// kernel: tpu_custom_call.1
= control target key start
LH: loop header
LB: loop body
LE: loop exit
PB: predicated region body
PF: predicated region fallthrough
CT: control target
= control target key end

     0   :  { %11 = vsyncpa [#allocation3], 0  ;;  %s1387_s0 = inlined_call_operand.hbm [shape: bf16[2,8,32], index: 0, kind: input, shape index: {}]   ;;  %s1388_s1 = inlined_call_operand.hbm [shape: bf16[32,96], index: 1, kind: input, shape index: {}]   ;;  %s1389_s2 = inlined_call_operand.vmem [shape: f32[1,96], index: 2, kind: input, shape index: {}]   ;;  %s1390_s3 = inlined_call_operand.hbm [shape: bf16[2,4,8,8], index: 3, kind: output, shape index: {0}]   ;;  %s1391_s4 = inlined_call_operand.hbm [shape: bf16[2,4,8,8], index: 4, kind: output, shape index: {1}]   ;;  %s1392_s5 = inlined_call_operand.hbm [shape: bf16[2,4,8,8], index: 5, kind: output, shape index: {2}]  }
   0x1   :  { %13 = vsyncpa [#allocation3 + $0x1], 0 }
   0x2   :  { %14 = vsyncpa [#allocation6], 0 }
   0x3   :  { %15 = vsyncpa [#allocation4], 0 }
   0x4   :  { %17 = vsyncpa [#allocation4 + $0x1], 0 }
   0x5   :  { %18 = vsyncpa [#allocation9], 0 }
   0x6   :  { %20 = vsyncpa [#allocation9 + $0x1], 0  ;;  %s1058_s18 = smov 0   ;;  %s1060_s19 = smov 0  }
   0x7   :  { %s1062_s20 = smov 0   ;;  %s1064_s21 = smov 0  }
   0x8   :  { %s1066_s22 = smov 0   ;;  %s1068_s23 = smov 0  }
   0x9 LB: > { %s1089_s24 = sadd.s32 4294967295, %s1005_s23   ;;  %s1396_s25 = sadd.s32 4294967294, %s1005_s23   ;;  %s1005_s23 = sphi %s1068_s23, %s26_s23   ;;  %s1001_s22 = sphi %s1066_s22, %s1418_s22   ;;  %s997_s21 = sphi %s1064_s21, %s1417_s21   ;;  %s993_s20 = sphi %s1062_s20, %s1416_s20   ;;  %s989_s19 = sphi %s1060_s19, %s1415_s19   ;;  %s985_s18 = sphi %s1058_s18, %s1414_s18  }
   0xa   : > { %p60_p0 = scmp.ne.s32.totalorder %s989_s19, %s985_s18  ;;  %p1393_p1 = scmp.eq.s32.totalorder %s1089_s24, 0 }
   0xb   : > { %p134_p3 = scmp.eq.s32.totalorder %s1396_s25, 1  ;;  %p647_p5 = scmp.ge.s32.totalorder %s1005_s23, 1 }
   0xc   : > { %p1100_p4 = por %p1393_p1, %p60_p0  ;;  %p197_p7 = scmp.lt.s32.totalorder %s1005_s23, 3 }
   0xd   : > { %p1105_p6 = por %p134_p3, %p60_p0  ;;  %s1007_s29 = smov [#allocation5]  }
   0xe   : > { %s1397_s26 = scalar_select %p1100_p4, 1, 0 }
   0xf   : > { %s1398_s27 = scalar_select %p1105_p6, 1, 0 }
  0x10   : > { %p1110_p8 = pnand %p647_p5, %p197_p7  ;;  %s209_s30 = sshll.u32 %s1007_s29, 4  ;;  %s210_s30 = int_to_ptr.vmem [resolvable:$true] %s209_s30 }
  0x11   : > { %s38_s7 = sadd.s32 1, %s1001_s22  ;;  %s801_s10 = scalar_lea.hbm %s1388_s1, 256 }
  0x12   : > { %s1399_s28 = scalar_select %p1110_p8, 1, 0 }
  0x13   : > { %p712_p9 = pneg %p1110_p8  ;;  %p802_p12 = scmp.ne.s32.totalorder %s1388_s1, %s801_s10 }
  0x14   : > { %p808_p5 = scmp.lt.u32.totalorder %s801_s10, %s1388_s1 }
  0x15   : > { %p1119_p11 = pnand %p712_p9, %p1393_p1 }
  0x17   : > { %p803_p13 = pneg %p1119_p11 }
  0x19   : > { %p804_p0 = pnand %p803_p13, %p802_p12 }
  0x1b   : > { %p805_p3 = pneg %p804_p0 }
  0x1d   : > { %p810_p7 = pnand %p808_p5, %p805_p3 }
  0x1f   : > { %813 = shalt.err (!%p810_p7)
}
  0x20   : > { %s814_s15 = scalar_lea.vmem %s210_s30, 256  ;;  %p822_p2 = scmp.lt.s32.totalorder %s210_s30, %s210_s30 }
  0x21   : > { %p815_p9 = scmp.ne.s32.totalorder %s210_s30, %s814_s15  ;;  %p823_p6 = scmp.lt.s32.totalorder %s814_s15, %s814_s15 }
  0x23   : > { %p817_p10 = pnand %p815_p9, %p803_p13  ;;  %p824_p4 = por %p823_p6, %p822_p2 }
  0x25   : > { %p818_p1 = pneg %p817_p10 }
  0x27   : > { %p825_p8 = pnand %p824_p4, %p818_p1 }
  0x29   : > { %828 = shalt.err (!%p825_p8)
}
  0x2a   : > { %s1008_s16 = smov 64   ;;  %s1009_s17 = smov 4  }
  0x2b   : > { %715 = dma.hbm_to_vmem [thread:$0]  (!%p1119_p11), %s1388_s1, 256, %s210_s30, [#allocation6], %s1008_s16, %s1008_s16, %s1009_s17  }
  0x2c   : > { %p40_p1 = scmp.ge.s32.totalorder %s38_s7, 2  ;;  %s47_s9 = sadd.s32 1, %s993_s20 }
  0x2d   : > { %p54_p2 = scmp.ne.s32.totalorder %s993_s20, %s989_s19  ;;  %p55_p4 = scmp.eq.s32.totalorder %s1005_s23, 0 }
  0x2e   : > { %s1420_s7 = smov (%p40_p1, %s38_s7), 0  ;;  %p1402_p8 = scmp.eq.s32.totalorder %s1089_s24, 1 }
  0x2f   : > { %p1146_p6 = por %p55_p4, %p54_p2  ;;  %s42_s6 = ssub.s32 %s1001_s22, %s1420_s7 }
  0x30   : > { %p1152_p10 = por %p1402_p8, %p54_p2  ;;  %p731_p12 = scmp.lt.s32.totalorder %s1005_s23, 2 }
  0x31   : > { %p45_p11 = scmp.eq.s32.totalorder %s42_s6, 0  ;;  %s226_s30 = sand.u32 1, %s993_s20  }
  0x32   : > { %s650_s12 = sshll.u32 %s226_s30, 2  ;;  %s651_s14 = sshll.u32 %s1001_s22, 6 }
  0x33   : > { %s1161_s13 = scalar_select %p45_p11, %s993_s20, %s47_s9  }
  0x34   : > { %s1167_s17 = scalar_lea.hbm %s1387_s0, %s651_s14  ;;  %s230_s29 = scalar_lea.vmem [#allocation2], %s650_s12 }
  0x35   : > { %s238_s8 = sshll.u32 %s230_s29, 4  ;;  %p1173_p13 = pnand %p731_p12, %p1146_p6  ;;  %s1169_s8 = int_to_ptr.vmem [resolvable:$true] %s238_s8 }
  0x36   : > { %s227_s9 = scalar_lea.sflag [#allocation3], %s226_s30  ;;  %s829_s25 = scalar_lea.hbm %s1167_s17, 64 }
  0x37   : > { %p830_p0 = scmp.ne.s32.totalorder %s1167_s17, %s829_s25  ;;  %p831_p3 = pneg %p1173_p13 }
  0x38   : > { %s834_s15 = scalar_lea.hbm %s1387_s0, 128  ;;  %p835_p9 = scmp.lt.u32.totalorder %s1167_s17, %s1387_s0 }
  0x39   : > { %p832_p5 = pnand %p831_p3, %p830_p0  ;;  %p836_p1 = scmp.lt.u32.totalorder %s834_s15, %s829_s25 }
  0x3a   : > { %p838_p4 = scmp.lt.u32.totalorder %s829_s25, %s1167_s17 }
  0x3b   : > { %p833_p7 = pneg %p832_p5  ;;  %p837_p2 = por %p836_p1, %p835_p9 }
  0x3d   : > { %p839_p6 = por %p838_p4, %p837_p2 }
  0x3f   : > { %p840_p8 = pnand %p839_p6, %p833_p7 }
  0x41   : > { %843 = shalt.err (!%p840_p8)
}
  0x42   : > { %s844_s30 = scalar_lea.vmem %s1169_s8, 64  ;;  %s1010_s29 = smov [#allocation2]  }
  0x43   : > { %p845_p12 = scmp.ne.s32.totalorder %s1169_s8, %s844_s30  ;;  %s849_s12 = sshll.u32 %s1010_s29, 4  ;;  %s850_s12 = int_to_ptr.vmem [resolvable:$false] %s849_s12 }
  0x44   : > { %s851_s14 = scalar_lea.vmem %s850_s12, 128  ;;  %p852_p5 = scmp.lt.s32.totalorder %s1169_s8, %s850_s12 }
  0x45   : > { %p847_p11 = pnand %p845_p12, %p831_p3  ;;  %p853_p9 = scmp.lt.s32.totalorder %s851_s14, %s844_s30 }
  0x47   : > { %p848_p0 = pneg %p847_p11  ;;  %p854_p1 = por %p853_p9, %p852_p5 }
  0x49   : > { %p855_p2 = pnand %p854_p1, %p848_p0 }
  0x4b   : > { %858 = shalt.err (!%p855_p2)
}
  0x4c   : > { %719 = dma.hbm_to_vmem [thread:$0]  (!%p1173_p13), %s1167_s17, 64, %s1169_s8, %s227_s9  }
  0x4d   : > { %p1405_p7 = scmp.ne.s32.totalorder %s1399_s28, 0 }
  0x4e   : > { %s1205_s25 = sand.u32 (!%p1405_p7), 1, %s989_s19   ;;  %p1406_p3 = scmp.ne.s32.totalorder (!%p1405_p7), %s1397_s26, 0 }
  0x4f   : > { %247 = sbr.rel (%p1405_p7) target bundleno = 496 (0x1f0), region = 32  ;;  %s653_s15 = sshll.u32 (!%p1405_p7), %s1205_s25, 2 }
  0x50   : > { %s250_s10 = scalar_lea.sflag (!%p1405_p7), [#allocation3], %s1205_s25  ;;  %s253_s16 = scalar_lea.vmem (!%p1405_p7), [#allocation2], %s653_s15 }
  0x56   : > { %968 = dma.done.wait (%p1406_p3), %s250_s10, 64  }
  0x57   : > { %970 = vsyncadd (%p1406_p3), %s250_s10, 4294967232  ;;  %p1407_p4 = scmp.eq.s32.totalorder %s1089_s24, 0 }
  0x59   : > { %972 = dma.done.wait (%p1407_p4), [#allocation6], 256   ;;  %p1408_p13 = pmov %p1407_p4 }
  0x5a   : > { %v1011_v0 = vmov 0.0   ;;  %vm1012_vm0 = vmmov 0   ;;  %v799_v1 = vld [vmem:[#allocation5] sm:$0xff]   ;;  %v800_v2 = vld [vmem:[#allocation5 + $0x8] sm:$0xff]   ;;  %v295_v3 = vld [vmem:[%s253_s16] sm:$0xf] }
  0x5b   : > { %974 = vsyncadd (%p1408_p13), [#allocation6], 4294967040  ;;  %692 = vmatprep.subr.bf16.mxu0 %v1011_v0  ;;  %696 = vmatprep.mubr.msk.bf16.mxu0 %vm1012_vm0, %v1011_v0  ;;  %vm319_vm1 = vcmask 261120   ;;  %v658_v4 = vld [vmem:[%s1389_s2] ss:$0 sm:$0xff]  ;;  %s1221_s17 = sshll.u32 %s1205_s25, 4 }
  0x5c   : > { %693 = vmatpush3.bf16.msra.mxu0 %v799_v1  ;;  %vm365_vm2 = vcmask 60416   ;;  %s1013_s8 = smov 80   ;;  %s1014_s6 = smov 96  }
  0x5d   : > { %694 = vmatprep.subr.bf16.mxu0 %v1011_v0  ;;  %s1224_s9 = scalar_lea.vmem [#allocation7], %s1221_s17  ;;  %s1015_s30 = smov 72  }
  0x5e   : > { %s1016_s29 = smov 88   ;;  %s1017_s12 = smov 64  }
  0x5f   : > { %s1018_s14 = smov 120   ;;  %s1019_s15 = smov 56  }
  0x60   : > { %695 = vmatpush3.bf16.msra.mxu0 %v800_v2  ;;  %s1020_s10 = smov 112   ;;  %s1021_s16 = smov 48  }
  0x61   : > { %s1022_s26 = smov 104   ;;  %s1023_s28 = smov 40  }
  0x63   : > { %697 = vmatmul.mubr.msk.bf16.vlgmr.msra.gmra.mrb[0].mxu0 %vm319_vm1, %v295_v3 }
 0x136   : > { %v357_v5 = vpop.f32.mrb[0].mxu0 }
 0x137   : > { %v358_v6 = vadd.f32 %v658_v4, %v357_v5  ;;  %v698_v7 = vpop.f32.mrb[1].mxu0 }
 0x138   : > { %v360_v8 = vpop.f32.mrb[2].mxu0 }
 0x139   : > { %v363_v9 = vmul.f32 0.35355338, %v358_v6  ;;  %v684_v10 = vpack.c.bf16 %v358_v6, %v358_v6  ;;  %v699_v11 = vpop.f32.mrb[3].mxu0 }
 0x13b   : > { %v364_v12 = vpack.c.bf16 %v363_v9, %v363_v9  ;;  %402 = vrot.lane.b32.xlu1 %v684_v10, %s1013_s8  ;;  %371 = vrot.lane.b32.xlu0 %v684_v10, %s1014_s6  ;;  %s286_s8 = scalar_lea.vmem [#allocation8], %s1221_s17 }
 0x13c   : > { %s469_s6 = sshll.u32 %s286_s8, 4  ;;  %s1236_s6 = int_to_ptr.vmem [resolvable:$true] %s469_s6 }
 0x13d   : > { %366 = vst.msk [vmem:[%s1224_s9] sm:$0xf] %vm365_vm2, %v364_v12 }
 0x13f   : > { %417 = vrot.lane.b32.xlu1 %v684_v10, %s1015_s30  ;;  %387 = vrot.lane.b32.xlu0 %v684_v10, %s1016_s29  ;;  %s432_s30 = sand.u32 1, %s1089_s24   ;;  %s1232_s29 = sshll.u32 %s997_s21, 8 }
 0x140   : > { %s1246_s21 = scalar_lea.sflag [#allocation9], %s432_s30  ;;  %s859_s24 = scalar_lea.vmem %s1236_s6, 256 }
 0x141   : > { %p860_p6 = scmp.ne.s32.totalorder %s1236_s6, %s859_s24 }
 0x143   : > { %375 = vrot.lane.b32.xlu0 %v684_v10, %s1017_s12  ;;  %382 = vrot.lane.b32.xlu1 %v364_v12, %s1018_s14  ;;  %p861_p8 = pnand %p860_p6, %p1152_p10 }
 0x145   : > { %p862_p12 = pneg %p861_p8 }
 0x147   : > { %392 = vrot.lane.b32.xlu0 %v684_v10, %s1019_s15  ;;  %397 = vrot.lane.b32.xlu1 %v364_v12, %s1020_s10  ;;  %s1242_s10 = scalar_lea.hbm %s1391_s4, %s1232_s29 }
 0x14b   : > { %407 = vrot.lane.b32.xlu0 %v684_v10, %s1021_s16  ;;  %412 = vrot.lane.b32.xlu1 %v364_v12, %s1022_s26  ;;  %s1024_s16 = smov [#allocation8]  }
 0x14c   : > { %s863_s26 = sshll.u32 %s1024_s16, 4  ;;  %s864_s26 = int_to_ptr.vmem [resolvable:$false] %s863_s26 }
 0x14d   : > { %p866_p11 = scmp.lt.s32.totalorder %s1236_s6, %s864_s26 }
 0x14f   : > { %422 = vrot.lane.b32.xlu0 %v684_v10, %s1023_s28  ;;  %s865_s28 = scalar_lea.vmem %s864_s26, 512 }
 0x150   : > { %p867_p0 = scmp.lt.s32.totalorder %s865_s28, %s859_s24 }
 0x152   : > { %p868_p5 = por %p867_p0, %p866_p11 }
 0x154   : > { %p869_p9 = pnand %p868_p5, %p862_p12 }
 0x1ad   : > { %v403_v13 = vpop.permute.xlu1 %402  ;;  %v372_v14 = vpop.permute.xlu0 %371 }
 0x1ae   : > { %668 = vst.msk [vmem:[%s286_s8 + $0x8] sm:$0xf] %vm365_vm2, %v403_v13  ;;  %374 = vst.msk [vmem:[%s286_s8] sm:$0xf] %vm365_vm2, %v372_v14 }
 0x1b1   : > { %v418_v15 = vpop.permute.xlu1 %417  ;;  %v388_v16 = vpop.permute.xlu0 %387 }
 0x1b2   : > { %671 = vst.msk [vmem:[%s286_s8 + $0xc] sm:$0xf] %vm365_vm2, %v418_v15  ;;  %665 = vst.msk [vmem:[%s286_s8 + $0x4] sm:$0xf] %vm365_vm2, %v388_v16 }
 0x1b3   : > { %872 = shalt.err (!%p869_p9)
}
 0x1b4   : > { %s873_s8 = scalar_lea.hbm %s1242_s10, 256  ;;  %s877_s15 = scalar_lea.hbm %s1391_s4, 512 }
 0x1b5   : > { %p874_p1 = scmp.ne.s32.totalorder %s1242_s10, %s873_s8  ;;  %p878_p3 = scmp.lt.u32.totalorder %s1242_s10, %s1391_s4 }
 0x1b6   : > { %p879_p4 = scmp.lt.u32.totalorder %s877_s15, %s873_s8  ;;  %p881_p6 = scmp.lt.u32.totalorder %s873_s8, %s1242_s10 }
 0x1b7   : > { %p875_p2 = pnand %p874_p1, %p1152_p10 }
 0x1b8   : > { %p880_p13 = por %p879_p4, %p878_p3 }
 0x1b9   : > { %p876_p7 = pneg %p875_p2 }
 0x1ba   : > { %p882_p8 = por %p881_p6, %p880_p13 }
 0x1bc   : > { %p883_p12 = pnand %p882_p8, %p876_p7 }
 0x1be   : > { %886 = shalt.err (!%p883_p12)
}
 0x1bf   : > { %s1025_s24 = smov 4   ;;  %v376_v17 = vpop.permute.xlu0 %375  ;;  %v383_v18 = vpop.permute.xlu1 %382  ;;  %s1274_s28 = scalar_lea.vmem [#allocation10], %s1221_s17 }
 0x1c0   : > { %707 = dma.vmem_to_hbm [thread:$0]  (%p1152_p10), %s1236_s6, 256, %s1242_s10, %s1246_s21, %s1017_s12, %s1017_s12, %s1025_s24  }
 0x1c1   : > { %378 = vst.msk [vmem:[%s1274_s28] sm:$0xf] %vm365_vm2, %v376_v17  ;;  %664 = vst.msk [vmem:[%s1224_s9 + $0x4] sm:$0xf] %vm365_vm2, %v383_v18  ;;  %s452_s8 = sshll.u32 %s1224_s9, 4  ;;  %s1291_s10 = scalar_lea.hbm %s1390_s3, %s1232_s29  ;;  %s1285_s8 = int_to_ptr.vmem [resolvable:$true] %s452_s8 }
 0x1c2   : > { %s887_s15 = scalar_lea.vmem %s1285_s8, 256  ;;  %s1026_s16 = smov [#allocation7]  }
 0x1c3   : > { %v393_v19 = vpop.permute.xlu0 %392  ;;  %v398_v20 = vpop.permute.xlu1 %397  ;;  %p888_p11 = scmp.ne.s32.totalorder %s1285_s8, %s887_s15  ;;  %s891_s26 = sshll.u32 %s1026_s16, 4  ;;  %s892_s26 = int_to_ptr.vmem [resolvable:$false] %s891_s26 }
 0x1c4   : > { %666 = vst.msk [vmem:[%s1274_s28 + $0x4] sm:$0xf] %vm365_vm2, %v393_v19  ;;  %667 = vst.msk [vmem:[%s1224_s9 + $0x8] sm:$0xf] %vm365_vm2, %v398_v20  ;;  %s893_s17 = scalar_lea.vmem %s892_s26, 512  ;;  %p894_p9 = scmp.lt.s32.totalorder %s1285_s8, %s892_s26 }
 0x1c5   : > { %p889_p0 = pnand %p888_p11, %p1152_p10  ;;  %p895_p1 = scmp.lt.s32.totalorder %s893_s17, %s887_s15 }
 0x1c7   : > { %v408_v21 = vpop.permute.xlu0 %407  ;;  %v413_v22 = vpop.permute.xlu1 %412  ;;  %p890_p5 = pneg %p889_p0  ;;  %p896_p2 = por %p895_p1, %p894_p9 }
 0x1c8   : > { %669 = vst.msk [vmem:[%s1274_s28 + $0x8] sm:$0xf] %vm365_vm2, %v408_v21  ;;  %670 = vst.msk [vmem:[%s1224_s9 + $0xc] sm:$0xf] %vm365_vm2, %v413_v22 }
 0x1c9   : > { %p897_p7 = pnand %p896_p2, %p890_p5 }
 0x1cb   : > { %900 = shalt.err (!%p897_p7)
}
 0x1cc   : > { %s901_s9 = scalar_lea.hbm %s1291_s10, 256  ;;  %s905_s16 = scalar_lea.hbm %s1390_s3, 512 }
 0x1cd   : > { %p902_p3 = scmp.ne.s32.totalorder %s1291_s10, %s901_s9  ;;  %p906_p6 = scmp.lt.u32.totalorder %s1291_s10, %s1390_s3 }
 0x1ce   : > { %p907_p8 = scmp.lt.u32.totalorder %s905_s16, %s901_s9  ;;  %p909_p11 = scmp.lt.u32.totalorder %s901_s9, %s1291_s10 }
 0x1cf   : > { %p903_p4 = pnand %p902_p3, %p1152_p10 }
 0x1d0   : > { %p908_p12 = por %p907_p8, %p906_p6 }
 0x1d1   : > { %p904_p13 = pneg %p903_p4 }
 0x1d2   : > { %p910_p0 = por %p909_p11, %p908_p12 }
 0x1d4   : > { %p911_p5 = pnand %p910_p0, %p904_p13 }
 0x1d6   : > { %914 = shalt.err (!%p911_p5)
}
 0x1d7   : > { %s1409_s15 = scalar_lea.sflag [#allocation4], %s1205_s25  ;;  %s1410_s30 = sshll.u32 %s1274_s28, 4  ;;  %v423_v23 = vpop.permute.xlu0 %422  ;;  %s1327_s30 = int_to_ptr.vmem [resolvable:$true] %s1410_s30 }
 0x1d8   : > { %706 = dma.vmem_to_hbm [thread:$0]  (%p1152_p10), %s1285_s8, 256, %s1291_s10, %s1409_s15, %s1017_s12, %s1017_s12, %s1025_s24  }
 0x1d9   : > { %s1333_s9 = scalar_lea.hbm %s1392_s5, %s1232_s29  ;;  %672 = vst.msk [vmem:[%s1274_s28 + $0xc] sm:$0xf] %vm365_vm2, %v423_v23  ;;  %s915_s25 = scalar_lea.vmem %s1327_s30, 256 }
 0x1da   : > { %p916_p9 = scmp.ne.s32.totalorder %s1327_s30, %s915_s25  ;;  %s1027_s8 = smov [#allocation10]  }
 0x1db   : > { %s919_s10 = sshll.u32 %s1027_s8, 4  ;;  %s920_s10 = int_to_ptr.vmem [resolvable:$false] %s919_s10 }
 0x1dc   : > { %p917_p1 = pnand %p916_p9, %p1152_p10  ;;  %s921_s6 = scalar_lea.vmem %s920_s10, 512 }
 0x1dd   : > { %p922_p7 = scmp.lt.s32.totalorder %s1327_s30, %s920_s10  ;;  %p923_p3 = scmp.lt.s32.totalorder %s921_s6, %s915_s25 }
 0x1de   : > { %p918_p2 = pneg %p917_p1 }
 0x1df   : > { %p924_p4 = por %p923_p3, %p922_p7 }
 0x1e1   : > { %p925_p13 = pnand %p924_p4, %p918_p2 }
 0x1e3   : > { %928 = shalt.err (!%p925_p13)
}
 0x1e4   : > { %s929_s29 = scalar_lea.hbm %s1333_s9, 256  ;;  %s933_s26 = scalar_lea.hbm %s1392_s5, 512 }
 0x1e5   : > { %p930_p6 = scmp.ne.s32.totalorder %s1333_s9, %s929_s29  ;;  %p934_p11 = scmp.lt.u32.totalorder %s1333_s9, %s1392_s5 }
 0x1e6   : > { %p935_p0 = scmp.lt.u32.totalorder %s933_s26, %s929_s29  ;;  %p937_p9 = scmp.lt.u32.totalorder %s929_s29, %s1333_s9 }
 0x1e7   : > { %p931_p8 = pnand %p930_p6, %p1152_p10 }
 0x1e8   : > { %p936_p5 = por %p935_p0, %p934_p11 }
 0x1e9   : > { %p932_p12 = pneg %p931_p8 }
 0x1ea   : > { %p938_p1 = por %p937_p9, %p936_p5 }
 0x1ec   : > { %p939_p2 = pnand %p938_p1, %p932_p12 }
 0x1ee   : > { %942 = shalt.err (!%p939_p2)
}
 0x1ef   : > { %708 = dma.vmem_to_hbm [thread:$0]  (%p1152_p10), %s1327_s30, 256, %s1333_s9, %s1246_s21, %s1017_s12, %s1017_s12, %s1025_s24  }
 0x1f0 PF: > { %s501_s17 = sand.u32 1, %s985_s18   ;;  %p1411_p7 = scmp.ne.s32.totalorder %s1398_s27, 0 }
 0x1f1   : > { %p1412_p3 = scmp.ge.s32.totalorder %s1005_s23, 2  ;;  %s502_s25 = scalar_lea.sflag [#allocation4], %s501_s17 }
 0x1f3   : > { %p721_p4 = pnand %p1412_p3, %p1411_p7 }
 0x1f5   : > { %976 = dma.done.wait (!%p721_p4), %s502_s25, 256  }
 0x1f6   : > { %978 = vsyncadd (!%p721_p4), %s502_s25, 4294967040  ;;  %s1413_s11 = sadd.s32 4294967294, %s1005_s23  }
 0x1f7   : > { %s510_s8 = sand.u32 1, %s1413_s11  }
 0x1f8   : > { %s511_s10 = scalar_lea.sflag [#allocation9], %s510_s8 }
 0x1f9   : > { %980 = dma.done.wait (!%p721_p4), %s511_s10, 512  }
 0x1fa   : > { %982 = vsyncadd (!%p721_p4), %s511_s10, 4294966784  ;;  %s26_s23 = sadd.s32 1, %s1005_s23   ;;  %s1414_s18 = smov %s989_s19 }
 0x1fb   : > { %p23_p10 = scmp.ge.s32.totalorder %s26_s23, 4   ;;  %s1415_s19 = smov %s993_s20 }
 0x1fc   : > { %s1416_s20 = smov %s1161_s13  ;;  %s1417_s21 = smov %s1001_s22 }
 0x1fd   : > { %s1418_s22 = smov %s1420_s7  ;;  %25 = sbr.rel (!%p23_p10) target bundleno = 9 (0x9), region = 122 }
 0x204   :  { %525 = vsyncpa [#allocation3], 1 }
 0x205   :  { %527 = vsyncpa [#allocation3 + $0x1], 1 }
 0x206   :  { %528 = vsyncpa [#allocation6], 1 }
 0x207   :  { %529 = vsyncpa [#allocation4], 1 }
 0x208   :  { %531 = vsyncpa [#allocation4 + $0x1], 1 }
 0x209   :  { %532 = vsyncpa [#allocation9], 1 }
 0x20a   :  { %534 = vsyncpa [#allocation9 + $0x1], 1 }

// kernel: tpu_custom_call.1
= control target key start
LH: loop header
LB: loop body
LE: loop exit
PB: predicated region body
PF: predicated region fallthrough
CT: control target
= control target key end

     0   :  { %11 = vsyncpa [#allocation3], 0  ;;  %s1387_s0 = inlined_call_operand.hbm [shape: bf16[2,8,32], index: 0, kind: input, shape index: {}]   ;;  %s1388_s1 = inlined_call_operand.hbm [shape: bf16[32,96], index: 1, kind: input, shape index: {}]   ;;  %s1389_s2 = inlined_call_operand.vmem [shape: f32[1,96], index: 2, kind: input, shape index: {}]   ;;  %s1390_s3 = inlined_call_operand.hbm [shape: bf16[2,4,8,8], index: 3, kind: output, shape index: {0}]   ;;  %s1391_s4 = inlined_call_operand.hbm [shape: bf16[2,4,8,8], index: 4, kind: output, shape index: {1}]   ;;  %s1392_s5 = inlined_call_operand.hbm [shape: bf16[2,4,8,8], index: 5, kind: output, shape index: {2}]  }
   0x1   :  { %13 = vsyncpa [#allocation3 + $0x1], 0 }
   0x2   :  { %14 = vsyncpa [#allocation6], 0 }
   0x3   :  { %15 = vsyncpa [#allocation4], 0 }
   0x4   :  { %17 = vsyncpa [#allocation4 + $0x1], 0 }
   0x5   :  { %18 = vsyncpa [#allocation9], 0 }
   0x6   :  { %20 = vsyncpa [#allocation9 + $0x1], 0  ;;  %s1058_s18 = smov 0   ;;  %s1060_s19 = smov 0  }
   0x7   :  { %s1062_s20 = smov 0   ;;  %s1064_s21 = smov 0  }
   0x8   :  { %s1066_s22 = smov 0   ;;  %s1068_s23 = smov 0  }
   0x9 LB: > { %s1089_s24 = sadd.s32 4294967295, %s1005_s23   ;;  %s1396_s25 = sadd.s32 4294967294, %s1005_s23   ;;  %s1005_s23 = sphi %s1068_s23, %s26_s23   ;;  %s1001_s22 = sphi %s1066_s22, %s1418_s22   ;;  %s997_s21 = sphi %s1064_s21, %s1417_s21   ;;  %s993_s20 = sphi %s1062_s20, %s1416_s20   ;;  %s989_s19 = sphi %s1060_s19, %s1415_s19   ;;  %s985_s18 = sphi %s1058_s18, %s1414_s18  }
   0xa   : > { %p60_p0 = scmp.ne.s32.totalorder %s989_s19, %s985_s18  ;;  %p1393_p1 = scmp.eq.s32.totalorder %s1089_s24, 0 }
   0xb   : > { %p134_p3 = scmp.eq.s32.totalorder %s1396_s25, 1  ;;  %p647_p5 = scmp.ge.s32.totalorder %s1005_s23, 1 }
   0xc   : > { %p1100_p4 = por %p1393_p1, %p60_p0  ;;  %p197_p7 = scmp.lt.s32.totalorder %s1005_s23, 3 }
   0xd   : > { %p1105_p6 = por %p134_p3, %p60_p0  ;;  %s1007_s29 = smov [#allocation5]  }
   0xe   : > { %s1397_s26 = scalar_select %p1100_p4, 1, 0 }
   0xf   : > { %s1398_s27 = scalar_select %p1105_p6, 1, 0 }
  0x10   : > { %p1110_p8 = pnand %p647_p5, %p197_p7  ;;  %s209_s30 = sshll.u32 %s1007_s29, 4  ;;  %s210_s30 = int_to_ptr.vmem [resolvable:$true] %s209_s30 }
  0x11   : > { %s38_s7 = sadd.s32 1, %s1001_s22  ;;  %s801_s10 = scalar_lea.hbm %s1388_s1, 256 }
  0x12   : > { %s1399_s28 = scalar_select %p1110_p8, 1, 0 }
  0x13   : > { %p712_p9 = pneg %p1110_p8  ;;  %p802_p12 = scmp.ne.s32.totalorder %s1388_s1, %s801_s10 }
  0x14   : > { %p808_p5 = scmp.lt.u32.totalorder %s801_s10, %s1388_s1 }
  0x15   : > { %p1119_p11 = pnand %p712_p9, %p1393_p1 }
  0x17   : > { %p803_p13 = pneg %p1119_p11 }
  0x19   : > { %p804_p0 = pnand %p803_p13, %p802_p12 }
  0x1b   : > { %p805_p3 = pneg %p804_p0 }
  0x1d   : > { %p810_p7 = pnand %p808_p5, %p805_p3 }
  0x1f   : > { %813 = shalt.err (!%p810_p7)
}
  0x20   : > { %s814_s15 = scalar_lea.vmem %s210_s30, 256  ;;  %p822_p2 = scmp.lt.s32.totalorder %s210_s30, %s210_s30 }
  0x21   : > { %p815_p9 = scmp.ne.s32.totalorder %s210_s30, %s814_s15  ;;  %p823_p6 = scmp.lt.s32.totalorder %s814_s15, %s814_s15 }
  0x23   : > { %p817_p10 = pnand %p815_p9, %p803_p13  ;;  %p824_p4 = por %p823_p6, %p822_p2 }
  0x25   : > { %p818_p1 = pneg %p817_p10 }
  0x27   : > { %p825_p8 = pnand %p824_p4, %p818_p1 }
  0x29   : > { %828 = shalt.err (!%p825_p8)
}
  0x2a   : > { %s1008_s16 = smov 64   ;;  %s1009_s17 = smov 4  }
  0x2b   : > { %715 = dma.hbm_to_vmem [thread:$0]  (!%p1119_p11), %s1388_s1, 256, %s210_s30, [#allocation6], %s1008_s16, %s1008_s16, %s1009_s17  }
  0x2c   : > { %p40_p1 = scmp.ge.s32.totalorder %s38_s7, 2  ;;  %s47_s9 = sadd.s32 1, %s993_s20 }
  0x2d   : > { %p54_p2 = scmp.ne.s32.totalorder %s993_s20, %s989_s19  ;;  %p55_p4 = scmp.eq.s32.totalorder %s1005_s23, 0 }
  0x2e   : > { %s1420_s7 = smov (%p40_p1, %s38_s7), 0  ;;  %p1402_p8 = scmp.eq.s32.totalorder %s1089_s24, 1 }
  0x2f   : > { %p1146_p6 = por %p55_p4, %p54_p2  ;;  %s42_s6 = ssub.s32 %s1001_s22, %s1420_s7 }
  0x30   : > { %p1152_p10 = por %p1402_p8, %p54_p2  ;;  %p731_p12 = scmp.lt.s32.totalorder %s1005_s23, 2 }
  0x31   : > { %p45_p11 = scmp.eq.s32.totalorder %s42_s6, 0  ;;  %s226_s30 = sand.u32 1, %s993_s20  }
  0x32   : > { %s650_s12 = sshll.u32 %s226_s30, 2  ;;  %s651_s14 = sshll.u32 %s1001_s22, 6 }
  0x33   : > { %s1161_s13 = scalar_select %p45_p11, %s993_s20, %s47_s9  }
  0x34   : > { %s1167_s17 = scalar_lea.hbm %s1387_s0, %s651_s14  ;;  %s230_s29 = scalar_lea.vmem [#allocation2], %s650_s12 }
  0x35   : > { %s238_s8 = sshll.u32 %s230_s29, 4  ;;  %p1173_p13 = pnand %p731_p12, %p1146_p6  ;;  %s1169_s8 = int_to_ptr.vmem [resolvable:$true] %s238_s8 }
  0x36   : > { %s227_s9 = scalar_lea.sflag [#allocation3], %s226_s30  ;;  %s829_s25 = scalar_lea.hbm %s1167_s17, 64 }
  0x37   : > { %p830_p0 = scmp.ne.s32.totalorder %s1167_s17, %s829_s25  ;;  %p831_p3 = pneg %p1173_p13 }
  0x38   : > { %s834_s15 = scalar_lea.hbm %s1387_s0, 128  ;;  %p835_p9 = scmp.lt.u32.totalorder %s1167_s17, %s1387_s0 }
  0x39   : > { %p832_p5 = pnand %p831_p3, %p830_p0  ;;  %p836_p1 = scmp.lt.u32.totalorder %s834_s15, %s829_s25 }
  0x3a   : > { %p838_p4 = scmp.lt.u32.totalorder %s829_s25, %s1167_s17 }
  0x3b   : > { %p833_p7 = pneg %p832_p5  ;;  %p837_p2 = por %p836_p1, %p835_p9 }
  0x3d   : > { %p839_p6 = por %p838_p4, %p837_p2 }
  0x3f   : > { %p840_p8 = pnand %p839_p6, %p833_p7 }
  0x41   : > { %843 = shalt.err (!%p840_p8)
}
  0x42   : > { %s844_s30 = scalar_lea.vmem %s1169_s8, 64  ;;  %s1010_s29 = smov [#allocation2]  }
  0x43   : > { %p845_p12 = scmp.ne.s32.totalorder %s1169_s8, %s844_s30  ;;  %s849_s12 = sshll.u32 %s1010_s29, 4  ;;  %s850_s12 = int_to_ptr.vmem [resolvable:$false] %s849_s12 }
  0x44   : > { %s851_s14 = scalar_lea.vmem %s850_s12, 128  ;;  %p852_p5 = scmp.lt.s32.totalorder %s1169_s8, %s850_s12 }
  0x45   : > { %p847_p11 = pnand %p845_p12, %p831_p3  ;;  %p853_p9 = scmp.lt.s32.totalorder %s851_s14, %s844_s30 }
  0x47   : > { %p848_p0 = pneg %p847_p11  ;;  %p854_p1 = por %p853_p9, %p852_p5 }
  0x49   : > { %p855_p2 = pnand %p854_p1, %p848_p0 }
  0x4b   : > { %858 = shalt.err (!%p855_p2)
}
  0x4c   : > { %719 = dma.hbm_to_vmem [thread:$0]  (!%p1173_p13), %s1167_s17, 64, %s1169_s8, %s227_s9  }
  0x4d   : > { %p1405_p7 = scmp.ne.s32.totalorder %s1399_s28, 0 }
  0x4e   : > { %s1205_s25 = sand.u32 (!%p1405_p7), 1, %s989_s19   ;;  %p1406_p3 = scmp.ne.s32.totalorder (!%p1405_p7), %s1397_s26, 0 }
  0x4f   : > { %247 = sbr.rel (%p1405_p7) target bundleno = 496 (0x1f0), region = 32  ;;  %s653_s15 = sshll.u32 (!%p1405_p7), %s1205_s25, 2 }
  0x50   : > { %s250_s10 = scalar_lea.sflag (!%p1405_p7), [#allocation3], %s1205_s25  ;;  %s253_s16 = scalar_lea.vmem (!%p1405_p7), [#allocation2], %s653_s15 }
  0x56   : > { %968 = dma.done.wait (%p1406_p3), %s250_s10, 64  }
  0x57   : > { %970 = vsyncadd (%p1406_p3), %s250_s10, 4294967232  ;;  %p1407_p4 = scmp.eq.s32.totalorder %s1089_s24, 0 }
  0x59   : > { %972 = dma.done.wait (%p1407_p4), [#allocation6], 256   ;;  %p1408_p13 = pmov %p1407_p4 }
  0x5a   : > { %v1011_v0 = vmov 0.0   ;;  %vm1012_vm0 = vmmov 0   ;;  %v799_v1 = vld [vmem:[#allocation5] sm:$0xff]   ;;  %v800_v2 = vld [vmem:[#allocation5 + $0x8] sm:$0xff]   ;;  %v295_v3 = vld [vmem:[%s253_s16] sm:$0xf] }
  0x5b   : > { %974 = vsyncadd (%p1408_p13), [#allocation6], 4294967040  ;;  %692 = vmatprep.subr.bf16.mxu0 %v1011_v0  ;;  %696 = vmatprep.mubr.msk.bf16.mxu0 %vm1012_vm0, %v1011_v0  ;;  %vm319_vm1 = vcmask 261120   ;;  %v658_v4 = vld [vmem:[%s1389_s2] ss:$0 sm:$0xff]  ;;  %s1221_s17 = sshll.u32 %s1205_s25, 4 }
  0x5c   : > { %693 = vmatpush3.bf16.msra.mxu0 %v799_v1  ;;  %vm365_vm2 = vcmask 60416   ;;  %s1013_s8 = smov 80   ;;  %s1014_s6 = smov 96  }
  0x5d   : > { %694 = vmatprep.subr.bf16.mxu0 %v1011_v0  ;;  %s1224_s9 = scalar_lea.vmem [#allocation7], %s1221_s17  ;;  %s1015_s30 = smov 72  }
  0x5e   : > { %s1016_s29 = smov 88   ;;  %s1017_s12 = smov 64  }
  0x5f   : > { %s1018_s14 = smov 120   ;;  %s1019_s15 = smov 56  }
  0x60   : > { %695 = vmatpush3.bf16.msra.mxu0 %v800_v2  ;;  %s1020_s10 = smov 112   ;;  %s1021_s16 = smov 48  }
  0x61   : > { %s1022_s26 = smov 104   ;;  %s1023_s28 = smov 40  }
  0x63   : > { %697 = vmatmul.mubr.msk.bf16.vlgmr.msra.gmra.mrb[0].mxu0 %vm319_vm1, %v295_v3 }
 0x136   : > { %v357_v5 = vpop.f32.mrb[0].mxu0 }
 0x137   : > { %v358_v6 = vadd.f32 %v658_v4, %v357_v5  ;;  %v698_v7 = vpop.f32.mrb[1].mxu0 }
 0x138   : > { %v360_v8 = vpop.f32.mrb[2].mxu0 }
 0x139   : > { %v363_v9 = vmul.f32 0.35355338, %v358_v6  ;;  %v684_v10 = vpack.c.bf16 %v358_v6, %v358_v6  ;;  %v699_v11 = vpop.f32.mrb[3].mxu0 }
 0x13b   : > { %v364_v12 = vpack.c.bf16 %v363_v9, %v363_v9  ;;  %402 = vrot.lane.b32.xlu1 %v684_v10, %s1013_s8  ;;  %371 = vrot.lane.b32.xlu0 %v684_v10, %s1014_s6  ;;  %s286_s8 = scalar_lea.vmem [#allocation8], %s1221_s17 }
 0x13c   : > { %s469_s6 = sshll.u32 %s286_s8, 4  ;;  %s1236_s6 = int_to_ptr.vmem [resolvable:$true] %s469_s6 }
 0x13d   : > { %366 = vst.msk [vmem:[%s1224_s9] sm:$0xf] %vm365_vm2, %v364_v12 }
 0x13f   : > { %417 = vrot.lane.b32.xlu1 %v684_v10, %s1015_s30  ;;  %387 = vrot.lane.b32.xlu0 %v684_v10, %s1016_s29  ;;  %s432_s30 = sand.u32 1, %s1089_s24   ;;  %s1232_s29 = sshll.u32 %s997_s21, 8 }
 0x140   : > { %s1246_s21 = scalar_lea.sflag [#allocation9], %s432_s30  ;;  %s859_s24 = scalar_lea.vmem %s1236_s6, 256 }
 0x141   : > { %p860_p6 = scmp.ne.s32.totalorder %s1236_s6, %s859_s24 }
 0x143   : > { %375 = vrot.lane.b32.xlu0 %v684_v10, %s1017_s12  ;;  %382 = vrot.lane.b32.xlu1 %v364_v12, %s1018_s14  ;;  %p861_p8 = pnand %p860_p6, %p1152_p10 }
 0x145   : > { %p862_p12 = pneg %p861_p8 }
 0x147   : > { %392 = vrot.lane.b32.xlu0 %v684_v10, %s1019_s15  ;;  %397 = vrot.lane.b32.xlu1 %v364_v12, %s1020_s10  ;;  %s1242_s10 = scalar_lea.hbm %s1391_s4, %s1232_s29 }
 0x14b   : > { %407 = vrot.lane.b32.xlu0 %v684_v10, %s1021_s16  ;;  %412 = vrot.lane.b32.xlu1 %v364_v12, %s1022_s26  ;;  %s1024_s16 = smov [#allocation8]  }
 0x14c   : > { %s863_s26 = sshll.u32 %s1024_s16, 4  ;;  %s864_s26 = int_to_ptr.vmem [resolvable:$false] %s863_s26 }
 0x14d   : > { %p866_p11 = scmp.lt.s32.totalorder %s1236_s6, %s864_s26 }
 0x14f   : > { %422 = vrot.lane.b32.xlu0 %v684_v10, %s1023_s28  ;;  %s865_s28 = scalar_lea.vmem %s864_s26, 512 }
 0x150   : > { %p867_p0 = scmp.lt.s32.totalorder %s865_s28, %s859_s24 }
 0x152   : > { %p868_p5 = por %p867_p0, %p866_p11 }
 0x154   : > { %p869_p9 = pnand %p868_p5, %p862_p12 }
 0x1ad   : > { %v403_v13 = vpop.permute.xlu1 %402  ;;  %v372_v14 = vpop.permute.xlu0 %371 }
 0x1ae   : > { %668 = vst.msk [vmem:[%s286_s8 + $0x8] sm:$0xf] %vm365_vm2, %v403_v13  ;;  %374 = vst.msk [vmem:[%s286_s8] sm:$0xf] %vm365_vm2, %v372_v14 }
 0x1b1   : > { %v418_v15 = vpop.permute.xlu1 %417  ;;  %v388_v16 = vpop.permute.xlu0 %387 }
 0x1b2   : > { %671 = vst.msk [vmem:[%s286_s8 + $0xc] sm:$0xf] %vm365_vm2, %v418_v15  ;;  %665 = vst.msk [vmem:[%s286_s8 + $0x4] sm:$0xf] %vm365_vm2, %v388_v16 }
 0x1b3   : > { %872 = shalt.err (!%p869_p9)
}
 0x1b4   : > { %s873_s8 = scalar_lea.hbm %s1242_s10, 256  ;;  %s877_s15 = scalar_lea.hbm %s1391_s4, 512 }
 0x1b5   : > { %p874_p1 = scmp.ne.s32.totalorder %s1242_s10, %s873_s8  ;;  %p878_p3 = scmp.lt.u32.totalorder %s1242_s10, %s1391_s4 }
 0x1b6   : > { %p879_p4 = scmp.lt.u32.totalorder %s877_s15, %s873_s8  ;;  %p881_p6 = scmp.lt.u32.totalorder %s873_s8, %s1242_s10 }
 0x1b7   : > { %p875_p2 = pnand %p874_p1, %p1152_p10 }
 0x1b8   : > { %p880_p13 = por %p879_p4, %p878_p3 }
 0x1b9   : > { %p876_p7 = pneg %p875_p2 }
 0x1ba   : > { %p882_p8 = por %p881_p6, %p880_p13 }
 0x1bc   : > { %p883_p12 = pnand %p882_p8, %p876_p7 }
 0x1be   : > { %886 = shalt.err (!%p883_p12)
}
 0x1bf   : > { %s1025_s24 = smov 4   ;;  %v376_v17 = vpop.permute.xlu0 %375  ;;  %v383_v18 = vpop.permute.xlu1 %382  ;;  %s1274_s28 = scalar_lea.vmem [#allocation10], %s1221_s17 }
 0x1c0   : > { %707 = dma.vmem_to_hbm [thread:$0]  (%p1152_p10), %s1236_s6, 256, %s1242_s10, %s1246_s21, %s1017_s12, %s1017_s12, %s1025_s24  }
 0x1c1   : > { %378 = vst.msk [vmem:[%s1274_s28] sm:$0xf] %vm365_vm2, %v376_v17  ;;  %664 = vst.msk [vmem:[%s1224_s9 + $0x4] sm:$0xf] %vm365_vm2, %v383_v18  ;;  %s452_s8 = sshll.u32 %s1224_s9, 4  ;;  %s1291_s10 = scalar_lea.hbm %s1390_s3, %s1232_s29  ;;  %s1285_s8 = int_to_ptr.vmem [resolvable:$true] %s452_s8 }
 0x1c2   : > { %s887_s15 = scalar_lea.vmem %s1285_s8, 256  ;;  %s1026_s16 = smov [#allocation7]  }
 0x1c3   : > { %v393_v19 = vpop.permute.xlu0 %392  ;;  %v398_v20 = vpop.permute.xlu1 %397  ;;  %p888_p11 = scmp.ne.s32.totalorder %s1285_s8, %s887_s15  ;;  %s891_s26 = sshll.u32 %s1026_s16, 4  ;;  %s892_s26 = int_to_ptr.vmem [resolvable:$false] %s891_s26 }
 0x1c4   : > { %666 = vst.msk [vmem:[%s1274_s28 + $0x4] sm:$0xf] %vm365_vm2, %v393_v19  ;;  %667 = vst.msk [vmem:[%s1224_s9 + $0x8] sm:$0xf] %vm365_vm2, %v398_v20  ;;  %s893_s17 = scalar_lea.vmem %s892_s26, 512  ;;  %p894_p9 = scmp.lt.s32.totalorder %s1285_s8, %s892_s26 }
 0x1c5   : > { %p889_p0 = pnand %p888_p11, %p1152_p10  ;;  %p895_p1 = scmp.lt.s32.totalorder %s893_s17, %s887_s15 }
 0x1c7   : > { %v408_v21 = vpop.permute.xlu0 %407  ;;  %v413_v22 = vpop.permute.xlu1 %412  ;;  %p890_p5 = pneg %p889_p0  ;;  %p896_p2 = por %p895_p1, %p894_p9 }
 0x1c8   : > { %669 = vst.msk [vmem:[%s1274_s28 + $0x8] sm:$0xf] %vm365_vm2, %v408_v21  ;;  %670 = vst.msk [vmem:[%s1224_s9 + $0xc] sm:$0xf] %vm365_vm2, %v413_v22 }
 0x1c9   : > { %p897_p7 = pnand %p896_p2, %p890_p5 }
 0x1cb   : > { %900 = shalt.err (!%p897_p7)
}
 0x1cc   : > { %s901_s9 = scalar_lea.hbm %s1291_s10, 256  ;;  %s905_s16 = scalar_lea.hbm %s1390_s3, 512 }
 0x1cd   : > { %p902_p3 = scmp.ne.s32.totalorder %s1291_s10, %s901_s9  ;;  %p906_p6 = scmp.lt.u32.totalorder %s1291_s10, %s1390_s3 }
 0x1ce   : > { %p907_p8 = scmp.lt.u32.totalorder %s905_s16, %s901_s9  ;;  %p909_p11 = scmp.lt.u32.totalorder %s901_s9, %s1291_s10 }
 0x1cf   : > { %p903_p4 = pnand %p902_p3, %p1152_p10 }
 0x1d0   : > { %p908_p12 = por %p907_p8, %p906_p6 }
 0x1d1   : > { %p904_p13 = pneg %p903_p4 }
 0x1d2   : > { %p910_p0 = por %p909_p11, %p908_p12 }
 0x1d4   : > { %p911_p5 = pnand %p910_p0, %p904_p13 }
 0x1d6   : > { %914 = shalt.err (!%p911_p5)
}
 0x1d7   : > { %s1409_s15 = scalar_lea.sflag [#allocation4], %s1205_s25  ;;  %s1410_s30 = sshll.u32 %s1274_s28, 4  ;;  %v423_v23 = vpop.permute.xlu0 %422  ;;  %s1327_s30 = int_to_ptr.vmem [resolvable:$true] %s1410_s30 }
 0x1d8   : > { %706 = dma.vmem_to_hbm [thread:$0]  (%p1152_p10), %s1285_s8, 256, %s1291_s10, %s1409_s15, %s1017_s12, %s1017_s12, %s1025_s24  }
 0x1d9   : > { %s1333_s9 = scalar_lea.hbm %s1392_s5, %s1232_s29  ;;  %672 = vst.msk [vmem:[%s1274_s28 + $0xc] sm:$0xf] %vm365_vm2, %v423_v23  ;;  %s915_s25 = scalar_lea.vmem %s1327_s30, 256 }
 0x1da   : > { %p916_p9 = scmp.ne.s32.totalorder %s1327_s30, %s915_s25  ;;  %s1027_s8 = smov [#allocation10]  }
 0x1db   : > { %s919_s10 = sshll.u32 %s1027_s8, 4  ;;  %s920_s10 = int_to_ptr.vmem [resolvable:$false] %s919_s10 }
 0x1dc   : > { %p917_p1 = pnand %p916_p9, %p1152_p10  ;;  %s921_s6 = scalar_lea.vmem %s920_s10, 512 }
 0x1dd   : > { %p922_p7 = scmp.lt.s32.totalorder %s1327_s30, %s920_s10  ;;  %p923_p3 = scmp.lt.s32.totalorder %s921_s6, %s915_s25 }
 0x1de   : > { %p918_p2 = pneg %p917_p1 }
 0x1df   : > { %p924_p4 = por %p923_p3, %p922_p7 }
 0x1e1   : > { %p925_p13 = pnand %p924_p4, %p918_p2 }
 0x1e3   : > { %928 = shalt.err (!%p925_p13)
}
 0x1e4   : > { %s929_s29 = scalar_lea.hbm %s1333_s9, 256  ;;  %s933_s26 = scalar_lea.hbm %s1392_s5, 512 }
 0x1e5   : > { %p930_p6 = scmp.ne.s32.totalorder %s1333_s9, %s929_s29  ;;  %p934_p11 = scmp.lt.u32.totalorder %s1333_s9, %s1392_s5 }
 0x1e6   : > { %p935_p0 = scmp.lt.u32.totalorder %s933_s26, %s929_s29  ;;  %p937_p9 = scmp.lt.u32.totalorder %s929_s29, %s1333_s9 }
 0x1e7   : > { %p931_p8 = pnand %p930_p6, %p1152_p10 }
 0x1e8   : > { %p936_p5 = por %p935_p0, %p934_p11 }
 0x1e9   : > { %p932_p12 = pneg %p931_p8 }
 0x1ea   : > { %p938_p1 = por %p937_p9, %p936_p5 }
 0x1ec   : > { %p939_p2 = pnand %p938_p1, %p932_p12 }
 0x1ee   : > { %942 = shalt.err (!%p939_p2)
}
 0x1ef   : > { %708 = dma.vmem_to_hbm [thread:$0]  (%p1152_p10), %s1327_s30, 256, %s1333_s9, %s1246_s21, %s1017_s12, %s1017_s12, %s1025_s24  }
 0x1f0 PF: > { %s501_s17 = sand.u32 1, %s985_s18   ;;  %p1411_p7 = scmp.ne.s32.totalorder %s1398_s27, 0 }
 0x1f1   : > { %p1412_p3 = scmp.ge.s32.totalorder %s1005_s23, 2  ;;  %s502_s25 = scalar_lea.sflag [#allocation4], %s501_s17 }
 0x1f3   : > { %p721_p4 = pnand %p1412_p3, %p1411_p7 }
 0x1f5   : > { %976 = dma.done.wait (!%p721_p4), %s502_s25, 256  }
 0x1f6   : > { %978 = vsyncadd (!%p721_p4), %s502_s25, 4294967040  ;;  %s1413_s11 = sadd.s32 4294967294, %s1005_s23  }
 0x1f7   : > { %s510_s8 = sand.u32 1, %s1413_s11  }
 0x1f8   : > { %s511_s10 = scalar_lea.sflag [#allocation9], %s510_s8 }
 0x1f9   : > { %980 = dma.done.wait (!%p721_p4), %s511_s10, 512  }
 0x1fa   : > { %982 = vsyncadd (!%p721_p4), %s511_s10, 4294966784  ;;  %s26_s23 = sadd.s32 1, %s1005_s23   ;;  %s1414_s18 = smov %s989_s19 }
 0x1fb   : > { %p23_p10 = scmp.ge.s32.totalorder %s26_s23, 4   ;;  %s1415_s19 = smov %s993_s20 }
 0x1fc   : > { %s1416_s20 = smov %s1161_s13  ;;  %s1417_s21 = smov %s1001_s22 }
 0x1fd   : > { %s1418_s22 = smov %s1420_s7  ;;  %25 = sbr.rel (!%p23_p10) target bundleno = 9 (0x9), region = 122 }
 0x204   :  { %525 = vsyncpa [#allocation3], 1 }
 0x205   :  { %527 = vsyncpa [#allocation3 + $0x1], 1 }
 0x206   :  { %528 = vsyncpa [#allocation6], 1 }
 0x207   :  { %529 = vsyncpa [#allocation4], 1 }
 0x208   :  { %531 = vsyncpa [#allocation4 + $0x1], 1 }
 0x209   :  { %532 = vsyncpa [#allocation9], 1 }
 0x20a   :  { %534 = vsyncpa [#allocation9 + $0x1], 1 }

</bundles_post_ra>
